<compile_context>
chip_gen: v5e
topology: v5e:2x2
jax: 0.10.0
libtpu: 0.0.40
codegen_flags: <defaults>
</compile_context>

<pallas_src>
import math

import jax
import jax.numpy as jnp
from jax.experimental import pallas as pl
from jax.experimental.pallas import tpu as pltpu


def _round_up(n, m):
    return ((n + m - 1) // m) * m


# --------------------------- fused model kernel -------------------------------
def make_model_kernel(num_layers, hidden, seq_len, batch):
    H = hidden
    T = seq_len
    B = batch

    def kernel(x_ref, wih0_ref, b0_ref, whh0_ref, *refs):
        # refs layout: (w_cat_l, b_l) for layers 1..L-1, then w_fc, b_fc, out_ref
        upper = refs[: 2 * (num_layers - 1)]
        wfc_ref, bfc_ref, out_ref = refs[2 * (num_layers - 1):]

        # ---- hoisted layer-0 input projection over all T steps at once ----
        # x_ref: (T*B, D_in); single matmul, bias folded in.
        x_proj = (
            jnp.dot(x_ref[...], wih0_ref[...],
                    preferred_element_type=jnp.float32)
            + b0_ref[...]
        )                                                    # (T*B, 4H)

        # Hoist loop-invariant weight loads.
        whh0 = whh0_ref[...]                                 # (H, 4H)
        w_cat = [upper[2 * i][...] for i in range(num_layers - 1)]     # (2H, 4H)
        b_up = [upper[2 * i + 1][...] for i in range(num_layers - 1)]  # (1, 4H)
        w_fc = wfc_ref[...]                                  # (H, NKp)
        b_fc = bfc_ref[...]                                  # (1, NKp)

        # Recurrent state carried as values (tiny: (B, H) per layer), f32.
        h = [jnp.zeros((B, H), jnp.float32) for _ in range(num_layers)]
        c = [jnp.zeros((B, H), jnp.float32) for _ in range(num_layers)]

        def cell(gates, c_prev):
            # gates: (B, 4H), PyTorch gate order i, f, g, o.
            sig = jax.nn.sigmoid(gates)        # one EUP pass over all 128 lanes
            i_g = sig[:, 0 * H:1 * H]
            f_g = sig[:, 1 * H:2 * H]
            o_g = sig[:, 3 * H:4 * H]
            g_g = jnp.tanh(gates[:, 2 * H:3 * H])
            c_new = f_g * c_prev + i_g * g_g
            h_new = o_g * jnp.tanh(c_new)
            return h_new, c_new

        h_top = []
        for t in range(T):                    # short, static -> fully unrolled
            # ----- layer 0: input term precomputed; single hh matmul -----
            gates0 = x_proj[t * B:(t + 1) * B, :] + jnp.dot(
                h[0], whh0, preferred_element_type=jnp.float32)
            h[0], c[0] = cell(gates0, c[0])
            inp = h[0]
            # ----- upper layers: one fused [inp; h] @ [W_ih; W_hh] matmul -----
            for l in range(1, num_layers):
                cat = jnp.concatenate([inp, h[l]], axis=1)   # (B, 2H) lane concat
                gates = (
                    jnp.dot(cat, w_cat[l - 1],
                            preferred_element_type=jnp.float32)
                    + b_up[l - 1]
                )
                h[l], c[l] = cell(gates, c[l])
                inp = h[l]
            h_top.append(inp)

        # ---- deferred FC: one matmul + one dense lane-aligned store ----
        h_all = jnp.concatenate(h_top, axis=0)               # (T*B, H)
        out = jnp.dot(h_all, w_fc, preferred_element_type=jnp.float32) + b_fc
        out_ref[...] = out.astype(out_ref.dtype)             # (T*B, NKp) dense

    return kernel


# ------------------------------ parameter prep --------------------------------
def init_params(key, input_size, hidden_size, num_layers, num_keys):
    bound = 1.0 / math.sqrt(hidden_size)
    lstm_params = []
    for layer in range(num_layers):
        in_d = input_size if layer == 0 else hidden_size
        key, k1, k2, k3, k4 = jax.random.split(key, 5)
        w_ih = jax.random.uniform(k1, (4 * hidden_size, in_d),
                                  minval=-bound, maxval=bound, dtype=jnp.float32)
        w_hh = jax.random.uniform(k2, (4 * hidden_size, hidden_size),
                                  minval=-bound, maxval=bound, dtype=jnp.float32)
        b_ih = jax.random.uniform(k3, (4 * hidden_size,),
                                  minval=-bound, maxval=bound, dtype=jnp.float32)
        b_hh = jax.random.uniform(k4, (4 * hidden_size,),
                                  minval=-bound, maxval=bound, dtype=jnp.float32)
        lstm_params.append((w_ih, w_hh, b_ih, b_hh))
    key, k5, k6 = jax.random.split(key, 3)
    fc_bound = 1.0 / math.sqrt(hidden_size)
    w_fc = jax.random.uniform(k5, (num_keys, hidden_size),
                              minval=-fc_bound, maxval=fc_bound, dtype=jnp.float32)
    b_fc = jax.random.uniform(k6, (num_keys,),
                              minval=-fc_bound, maxval=fc_bound, dtype=jnp.float32)
    return lstm_params, (w_fc, b_fc)


def prepare_params(lstm_params, fc_params):
    """One-time layout prep: transpose, sum biases, stack [W_ih;W_hh] for
    layers >= 1, and pad the FC to 128 output lanes for a dense store."""
    w_ih0, w_hh0, b_ih0, b_hh0 = lstm_params[0]
    flat = [
        jnp.transpose(w_ih0),                           # (D_in, 4H)
        (b_ih0 + b_hh0).reshape(1, -1),                 # (1, 4H)
        jnp.transpose(w_hh0),                           # (H, 4H)
    ]
    for (w_ih, w_hh, b_ih, b_hh) in lstm_params[1:]:
        w_cat = jnp.concatenate(
            [jnp.transpose(w_ih), jnp.transpose(w_hh)], axis=0)  # (2H, 4H)
        flat.append(w_cat)
        flat.append((b_ih + b_hh).reshape(1, -1))       # (1, 4H)
    w_fc, b_fc = fc_params                              # (NK, H), (NK,)
    num_keys, hidden = w_fc.shape
    nk_pad = _round_up(num_keys, 128)
    w_fc_pad = jnp.zeros((hidden, nk_pad), jnp.float32).at[:, :num_keys].set(
        jnp.transpose(w_fc))
    b_fc_pad = jnp.zeros((1, nk_pad), jnp.float32).at[:, :num_keys].set(
        b_fc.reshape(1, -1))
    flat.append(w_fc_pad)
    flat.append(b_fc_pad)
    return flat, num_keys, nk_pad


# --------------------------------- forward ------------------------------------
def model_forward(x, prepared, hidden_size, num_layers, num_keys, nk_pad):
    # x: (B, T, input_size), batch-first like the PyTorch module.
    B, T, D_in = x.shape
    # Time-major flatten (XLA side) so each step's rows are a contiguous,
    # statically-indexed sublane slab inside the kernel.
    x_tb = jnp.transpose(x, (1, 0, 2)).reshape(T * B, D_in)
    kernel = make_model_kernel(num_layers, hidden_size, T, B)
    n_in = 1 + len(prepared)
    out_flat = pl.pallas_call(
        kernel,
        out_shape=jax.ShapeDtypeStruct((T * B, nk_pad), jnp.float32),
        in_specs=[pl.BlockSpec(memory_space=pltpu.MemorySpace.VMEM)
                  for _ in range(n_in)],
        out_specs=pl.BlockSpec(memory_space=pltpu.MemorySpace.VMEM),
    )(x_tb, *prepared)
    # Layout reshuffle + un-pad back in XLA (effectively free at this size).
    out = out_flat.reshape(T, B, nk_pad).transpose(1, 0, 2)
    return out[:, :, :num_keys]                          # (B, T, num_keys)


# ------------------------------- pure-JAX ref ----------------------------------
def reference_forward(x, lstm_params, fc_params):
    B, _, _ = x.shape
    h_seq = x
    for (w_ih, w_hh, b_ih, b_hh) in lstm_params:
        H = w_hh.shape[1]

        def step(carry, x_t, w_ih=w_ih, w_hh=w_hh, b_ih=b_ih, b_hh=b_hh, H=H):
            h, c = carry
            gates = x_t @ w_ih.T + h @ w_hh.T + b_ih + b_hh
            i = jax.nn.sigmoid(gates[:, 0 * H:1 * H])
            f = jax.nn.sigmoid(gates[:, 1 * H:2 * H])
            g = jnp.tanh(gates[:, 2 * H:3 * H])
            o = jax.nn.sigmoid(gates[:, 3 * H:4 * H])
            c = f * c + i * g
            h = o * jnp.tanh(c)
            return (h, c), h

        init = (jnp.zeros((B, H), jnp.float32), jnp.zeros((B, H), jnp.float32))
        _, ys = jax.lax.scan(step, init, jnp.transpose(h_seq, (1, 0, 2)))
        h_seq = jnp.transpose(ys, (1, 0, 2))
    w_fc, b_fc = fc_params
    return h_seq @ w_fc.T + b_fc


# ----------------------------------- main --------------------------------------
if __name__ == "__main__":
    input_size = 16
    hidden_size = 32
    num_layers = 2
    num_keys = 8
    B, T = 2, 8

    key = jax.random.PRNGKey(0)
    key, xkey = jax.random.split(key)
    x = jax.random.normal(xkey, (B, T, input_size), dtype=jnp.float32)

    lstm_params, fc_params = init_params(key, input_size, hidden_size,
                                         num_layers, num_keys)
    prepared, nk, nk_pad = prepare_params(lstm_params, fc_params)

    out = model_forward(x, prepared, hidden_size, num_layers, nk, nk_pad)
    out = jax.block_until_ready(out)
    assert out.shape == (B, T, num_keys)

    ref = jax.block_until_ready(reference_forward(x, lstm_params, fc_params))
    assert jnp.allclose(out, ref, atol=1e-4, rtol=1e-4)

    print("KERNEL_OK")
</pallas_src>

<mosaic_0001>
module attributes {stable_mosaic.version = 11 : i64} {
  func.func @kernel(%arg0: memref<16x16xf32, #tpu.memory_space<vmem>>, %arg1: memref<16x128xf32, #tpu.memory_space<vmem>>, %arg2: memref<1x128xf32, #tpu.memory_space<vmem>>, %arg3: memref<32x128xf32, #tpu.memory_space<vmem>>, %arg4: memref<64x128xf32, #tpu.memory_space<vmem>>, %arg5: memref<1x128xf32, #tpu.memory_space<vmem>>, %arg6: memref<32x128xf32, #tpu.memory_space<vmem>>, %arg7: memref<1x128xf32, #tpu.memory_space<vmem>>, %arg8: memref<16x128xf32, #tpu.memory_space<vmem>>) attributes {dimension_semantics = [], scalar_prefetch = 0 : i64, scratch_operands = 0 : i64, tpu.core_type = #tpu.core_type<tc>} {
    %c0 = arith.constant 0 : index
    %c0_0 = arith.constant 0 : index
    %0 = vector.load %arg0[%c0, %c0_0] : memref<16x16xf32, #tpu.memory_space<vmem>>, vector<16x16xf32>
    %c0_1 = arith.constant 0 : index
    %c0_2 = arith.constant 0 : index
    %1 = vector.load %arg1[%c0_1, %c0_2] : memref<16x128xf32, #tpu.memory_space<vmem>>, vector<16x128xf32>
    %cst = arith.constant dense<0.000000e+00> : vector<16x128xf32>
    %2 = tpu.matmul %0, %1, %cst {dimension_numbers = #tpu.dot_dimension_numbers<[1], [0], [0], [1], [0, 0, 1, 1], [], []>} : vector<16x16xf32>, vector<16x128xf32>, vector<16x128xf32> -> vector<16x128xf32>
    %c0_3 = arith.constant 0 : index
    %c0_4 = arith.constant 0 : index
    %3 = vector.load %arg2[%c0_3, %c0_4] : memref<1x128xf32, #tpu.memory_space<vmem>>, vector<1x128xf32>
    %4 = vector.broadcast %3 : vector<1x128xf32> to vector<16x128xf32>
    %5 = arith.addf %2, %4 : vector<16x128xf32>
    %c0_5 = arith.constant 0 : index
    %c0_6 = arith.constant 0 : index
    %6 = vector.load %arg3[%c0_5, %c0_6] : memref<32x128xf32, #tpu.memory_space<vmem>>, vector<32x128xf32>
    %c0_7 = arith.constant 0 : index
    %c0_8 = arith.constant 0 : index
    %7 = vector.load %arg4[%c0_7, %c0_8] : memref<64x128xf32, #tpu.memory_space<vmem>>, vector<64x128xf32>
    %c0_9 = arith.constant 0 : index
    %c0_10 = arith.constant 0 : index
    %8 = vector.load %arg5[%c0_9, %c0_10] : memref<1x128xf32, #tpu.memory_space<vmem>>, vector<1x128xf32>
    %c0_11 = arith.constant 0 : index
    %c0_12 = arith.constant 0 : index
    %9 = vector.load %arg6[%c0_11, %c0_12] : memref<32x128xf32, #tpu.memory_space<vmem>>, vector<32x128xf32>
    %c0_13 = arith.constant 0 : index
    %c0_14 = arith.constant 0 : index
    %10 = vector.load %arg7[%c0_13, %c0_14] : memref<1x128xf32, #tpu.memory_space<vmem>>, vector<1x128xf32>
    %cst_15 = arith.constant 0.000000e+00 : f32
    %11 = vector.broadcast %cst_15 : f32 to vector<2x32xf32>
    %cst_16 = arith.constant 0.000000e+00 : f32
    %12 = vector.broadcast %cst_16 : f32 to vector<2x32xf32>
    %cst_17 = arith.constant 0.000000e+00 : f32
    %13 = vector.broadcast %cst_17 : f32 to vector<2x32xf32>
    %cst_18 = arith.constant 0.000000e+00 : f32
    %14 = vector.broadcast %cst_18 : f32 to vector<2x32xf32>
    %15 = vector.extract_strided_slice %5 {offsets = [0, 0], sizes = [2, 128], strides = [1, 1]} : vector<16x128xf32> to vector<2x128xf32>
    %cst_19 = arith.constant dense<0.000000e+00> : vector<2x128xf32>
    %16 = tpu.matmul %11, %6, %cst_19 {dimension_numbers = #tpu.dot_dimension_numbers<[1], [0], [0], [1], [0, 0, 1, 1], [], []>} : vector<2x32xf32>, vector<32x128xf32>, vector<2x128xf32> -> vector<2x128xf32>
    %17 = arith.addf %15, %16 : vector<2x128xf32>
    %18 = arith.negf %17 : vector<2x128xf32>
    %19 = math.exp %18 : vector<2x128xf32>
    %cst_20 = arith.constant 1.000000e+00 : f32
    %20 = vector.broadcast %cst_20 : f32 to vector<2x128xf32>
    %21 = arith.addf %20, %19 : vector<2x128xf32>
    %22 = arith.divf %20, %21 : vector<2x128xf32>
    %23 = vector.extract_strided_slice %22 {offsets = [0, 0], sizes = [2, 32], strides = [1, 1]} : vector<2x128xf32> to vector<2x32xf32>
    %24 = vector.extract_strided_slice %22 {offsets = [0, 32], sizes = [2, 32], strides = [1, 1]} : vector<2x128xf32> to vector<2x32xf32>
    %25 = vector.extract_strided_slice %22 {offsets = [0, 96], sizes = [2, 32], strides = [1, 1]} : vector<2x128xf32> to vector<2x32xf32>
    %26 = vector.extract_strided_slice %17 {offsets = [0, 64], sizes = [2, 32], strides = [1, 1]} : vector<2x128xf32> to vector<2x32xf32>
    %27 = math.tanh %26 : vector<2x32xf32>
    %28 = arith.mulf %24, %13 : vector<2x32xf32>
    %29 = arith.mulf %23, %27 : vector<2x32xf32>
    %30 = arith.addf %28, %29 : vector<2x32xf32>
    %31 = math.tanh %30 : vector<2x32xf32>
    %32 = arith.mulf %25, %31 : vector<2x32xf32>
    %33 = tpu.concatenate %32, %12 in 1 : vector<2x32xf32>, vector<2x32xf32> -> vector<2x64xf32>
    %cst_21 = arith.constant dense<0.000000e+00> : vector<2x128xf32>
    %34 = tpu.matmul %33, %7, %cst_21 {dimension_numbers = #tpu.dot_dimension_numbers<[1], [0], [0], [1], [0, 0, 1, 1], [], []>} : vector<2x64xf32>, vector<64x128xf32>, vector<2x128xf32> -> vector<2x128xf32>
    %35 = vector.broadcast %8 : vector<1x128xf32> to vector<2x128xf32>
    %36 = arith.addf %34, %35 : vector<2x128xf32>
    %37 = arith.negf %36 : vector<2x128xf32>
    %38 = math.exp %37 : vector<2x128xf32>
    %cst_22 = arith.constant 1.000000e+00 : f32
    %39 = vector.broadcast %cst_22 : f32 to vector<2x128xf32>
    %40 = arith.addf %39, %38 : vector<2x128xf32>
    %41 = arith.divf %39, %40 : vector<2x128xf32>
    %42 = vector.extract_strided_slice %41 {offsets = [0, 0], sizes = [2, 32], strides = [1, 1]} : vector<2x128xf32> to vector<2x32xf32>
    %43 = vector.extract_strided_slice %41 {offsets = [0, 32], sizes = [2, 32], strides = [1, 1]} : vector<2x128xf32> to vector<2x32xf32>
    %44 = vector.extract_strided_slice %41 {offsets = [0, 96], sizes = [2, 32], strides = [1, 1]} : vector<2x128xf32> to vector<2x32xf32>
    %45 = vector.extract_strided_slice %36 {offsets = [0, 64], sizes = [2, 32], strides = [1, 1]} : vector<2x128xf32> to vector<2x32xf32>
    %46 = math.tanh %45 : vector<2x32xf32>
    %47 = arith.mulf %43, %14 : vector<2x32xf32>
    %48 = arith.mulf %42, %46 : vector<2x32xf32>
    %49 = arith.addf %47, %48 : vector<2x32xf32>
    %50 = math.tanh %49 : vector<2x32xf32>
    %51 = arith.mulf %44, %50 : vector<2x32xf32>
    %52 = vector.extract_strided_slice %5 {offsets = [2, 0], sizes = [2, 128], strides = [1, 1]} : vector<16x128xf32> to vector<2x128xf32>
    %cst_23 = arith.constant dense<0.000000e+00> : vector<2x128xf32>
    %53 = tpu.matmul %32, %6, %cst_23 {dimension_numbers = #tpu.dot_dimension_numbers<[1], [0], [0], [1], [0, 0, 1, 1], [], []>} : vector<2x32xf32>, vector<32x128xf32>, vector<2x128xf32> -> vector<2x128xf32>
    %54 = arith.addf %52, %53 : vector<2x128xf32>
    %55 = arith.negf %54 : vector<2x128xf32>
    %56 = math.exp %55 : vector<2x128xf32>
    %cst_24 = arith.constant 1.000000e+00 : f32
    %57 = vector.broadcast %cst_24 : f32 to vector<2x128xf32>
    %58 = arith.addf %57, %56 : vector<2x128xf32>
    %59 = arith.divf %57, %58 : vector<2x128xf32>
    %60 = vector.extract_strided_slice %59 {offsets = [0, 0], sizes = [2, 32], strides = [1, 1]} : vector<2x128xf32> to vector<2x32xf32>
    %61 = vector.extract_strided_slice %59 {offsets = [0, 32], sizes = [2, 32], strides = [1, 1]} : vector<2x128xf32> to vector<2x32xf32>
    %62 = vector.extract_strided_slice %59 {offsets = [0, 96], sizes = [2, 32], strides = [1, 1]} : vector<2x128xf32> to vector<2x32xf32>
    %63 = vector.extract_strided_slice %54 {offsets = [0, 64], sizes = [2, 32], strides = [1, 1]} : vector<2x128xf32> to vector<2x32xf32>
    %64 = math.tanh %63 : vector<2x32xf32>
    %65 = arith.mulf %61, %30 : vector<2x32xf32>
    %66 = arith.mulf %60, %64 : vector<2x32xf32>
    %67 = arith.addf %65, %66 : vector<2x32xf32>
    %68 = math.tanh %67 : vector<2x32xf32>
    %69 = arith.mulf %62, %68 : vector<2x32xf32>
    %70 = tpu.concatenate %69, %51 in 1 : vector<2x32xf32>, vector<2x32xf32> -> vector<2x64xf32>
    %cst_25 = arith.constant dense<0.000000e+00> : vector<2x128xf32>
    %71 = tpu.matmul %70, %7, %cst_25 {dimension_numbers = #tpu.dot_dimension_numbers<[1], [0], [0], [1], [0, 0, 1, 1], [], []>} : vector<2x64xf32>, vector<64x128xf32>, vector<2x128xf32> -> vector<2x128xf32>
    %72 = vector.broadcast %8 : vector<1x128xf32> to vector<2x128xf32>
    %73 = arith.addf %71, %72 : vector<2x128xf32>
    %74 = arith.negf %73 : vector<2x128xf32>
    %75 = math.exp %74 : vector<2x128xf32>
    %cst_26 = arith.constant 1.000000e+00 : f32
    %76 = vector.broadcast %cst_26 : f32 to vector<2x128xf32>
    %77 = arith.addf %76, %75 : vector<2x128xf32>
    %78 = arith.divf %76, %77 : vector<2x128xf32>
    %79 = vector.extract_strided_slice %78 {offsets = [0, 0], sizes = [2, 32], strides = [1, 1]} : vector<2x128xf32> to vector<2x32xf32>
    %80 = vector.extract_strided_slice %78 {offsets = [0, 32], sizes = [2, 32], strides = [1, 1]} : vector<2x128xf32> to vector<2x32xf32>
    %81 = vector.extract_strided_slice %78 {offsets = [0, 96], sizes = [2, 32], strides = [1, 1]} : vector<2x128xf32> to vector<2x32xf32>
    %82 = vector.extract_strided_slice %73 {offsets = [0, 64], sizes = [2, 32], strides = [1, 1]} : vector<2x128xf32> to vector<2x32xf32>
    %83 = math.tanh %82 : vector<2x32xf32>
    %84 = arith.mulf %80, %49 : vector<2x32xf32>
    %85 = arith.mulf %79, %83 : vector<2x32xf32>
    %86 = arith.addf %84, %85 : vector<2x32xf32>
    %87 = math.tanh %86 : vector<2x32xf32>
    %88 = arith.mulf %81, %87 : vector<2x32xf32>
    %89 = vector.extract_strided_slice %5 {offsets = [4, 0], sizes = [2, 128], strides = [1, 1]} : vector<16x128xf32> to vector<2x128xf32>
    %cst_27 = arith.constant dense<0.000000e+00> : vector<2x128xf32>
    %90 = tpu.matmul %69, %6, %cst_27 {dimension_numbers = #tpu.dot_dimension_numbers<[1], [0], [0], [1], [0, 0, 1, 1], [], []>} : vector<2x32xf32>, vector<32x128xf32>, vector<2x128xf32> -> vector<2x128xf32>
    %91 = arith.addf %89, %90 : vector<2x128xf32>
    %92 = arith.negf %91 : vector<2x128xf32>
    %93 = math.exp %92 : vector<2x128xf32>
    %cst_28 = arith.constant 1.000000e+00 : f32
    %94 = vector.broadcast %cst_28 : f32 to vector<2x128xf32>
    %95 = arith.addf %94, %93 : vector<2x128xf32>
    %96 = arith.divf %94, %95 : vector<2x128xf32>
    %97 = vector.extract_strided_slice %96 {offsets = [0, 0], sizes = [2, 32], strides = [1, 1]} : vector<2x128xf32> to vector<2x32xf32>
    %98 = vector.extract_strided_slice %96 {offsets = [0, 32], sizes = [2, 32], strides = [1, 1]} : vector<2x128xf32> to vector<2x32xf32>
    %99 = vector.extract_strided_slice %96 {offsets = [0, 96], sizes = [2, 32], strides = [1, 1]} : vector<2x128xf32> to vector<2x32xf32>
    %100 = vector.extract_strided_slice %91 {offsets = [0, 64], sizes = [2, 32], strides = [1, 1]} : vector<2x128xf32> to vector<2x32xf32>
    %101 = math.tanh %100 : vector<2x32xf32>
    %102 = arith.mulf %98, %67 : vector<2x32xf32>
    %103 = arith.mulf %97, %101 : vector<2x32xf32>
    %104 = arith.addf %102, %103 : vector<2x32xf32>
    %105 = math.tanh %104 : vector<2x32xf32>
    %106 = arith.mulf %99, %105 : vector<2x32xf32>
    %107 = tpu.concatenate %106, %88 in 1 : vector<2x32xf32>, vector<2x32xf32> -> vector<2x64xf32>
    %cst_29 = arith.constant dense<0.000000e+00> : vector<2x128xf32>
    %108 = tpu.matmul %107, %7, %cst_29 {dimension_numbers = #tpu.dot_dimension_numbers<[1], [0], [0], [1], [0, 0, 1, 1], [], []>} : vector<2x64xf32>, vector<64x128xf32>, vector<2x128xf32> -> vector<2x128xf32>
    %109 = vector.broadcast %8 : vector<1x128xf32> to vector<2x128xf32>
    %110 = arith.addf %108, %109 : vector<2x128xf32>
    %111 = arith.negf %110 : vector<2x128xf32>
    %112 = math.exp %111 : vector<2x128xf32>
    %cst_30 = arith.constant 1.000000e+00 : f32
    %113 = vector.broadcast %cst_30 : f32 to vector<2x128xf32>
    %114 = arith.addf %113, %112 : vector<2x128xf32>
    %115 = arith.divf %113, %114 : vector<2x128xf32>
    %116 = vector.extract_strided_slice %115 {offsets = [0, 0], sizes = [2, 32], strides = [1, 1]} : vector<2x128xf32> to vector<2x32xf32>
    %117 = vector.extract_strided_slice %115 {offsets = [0, 32], sizes = [2, 32], strides = [1, 1]} : vector<2x128xf32> to vector<2x32xf32>
    %118 = vector.extract_strided_slice %115 {offsets = [0, 96], sizes = [2, 32], strides = [1, 1]} : vector<2x128xf32> to vector<2x32xf32>
    %119 = vector.extract_strided_slice %110 {offsets = [0, 64], sizes = [2, 32], strides = [1, 1]} : vector<2x128xf32> to vector<2x32xf32>
    %120 = math.tanh %119 : vector<2x32xf32>
    %121 = arith.mulf %117, %86 : vector<2x32xf32>
    %122 = arith.mulf %116, %120 : vector<2x32xf32>
    %123 = arith.addf %121, %122 : vector<2x32xf32>
    %124 = math.tanh %123 : vector<2x32xf32>
    %125 = arith.mulf %118, %124 : vector<2x32xf32>
    %126 = vector.extract_strided_slice %5 {offsets = [6, 0], sizes = [2, 128], strides = [1, 1]} : vector<16x128xf32> to vector<2x128xf32>
    %cst_31 = arith.constant dense<0.000000e+00> : vector<2x128xf32>
    %127 = tpu.matmul %106, %6, %cst_31 {dimension_numbers = #tpu.dot_dimension_numbers<[1], [0], [0], [1], [0, 0, 1, 1], [], []>} : vector<2x32xf32>, vector<32x128xf32>, vector<2x128xf32> -> vector<2x128xf32>
    %128 = arith.addf %126, %127 : vector<2x128xf32>
    %129 = arith.negf %128 : vector<2x128xf32>
    %130 = math.exp %129 : vector<2x128xf32>
    %cst_32 = arith.constant 1.000000e+00 : f32
    %131 = vector.broadcast %cst_32 : f32 to vector<2x128xf32>
    %132 = arith.addf %131, %130 : vector<2x128xf32>
    %133 = arith.divf %131, %132 : vector<2x128xf32>
    %134 = vector.extract_strided_slice %133 {offsets = [0, 0], sizes = [2, 32], strides = [1, 1]} : vector<2x128xf32> to vector<2x32xf32>
    %135 = vector.extract_strided_slice %133 {offsets = [0, 32], sizes = [2, 32], strides = [1, 1]} : vector<2x128xf32> to vector<2x32xf32>
    %136 = vector.extract_strided_slice %133 {offsets = [0, 96], sizes = [2, 32], strides = [1, 1]} : vector<2x128xf32> to vector<2x32xf32>
    %137 = vector.extract_strided_slice %128 {offsets = [0, 64], sizes = [2, 32], strides = [1, 1]} : vector<2x128xf32> to vector<2x32xf32>
    %138 = math.tanh %137 : vector<2x32xf32>
    %139 = arith.mulf %135, %104 : vector<2x32xf32>
    %140 = arith.mulf %134, %138 : vector<2x32xf32>
    %141 = arith.addf %139, %140 : vector<2x32xf32>
    %142 = math.tanh %141 : vector<2x32xf32>
    %143 = arith.mulf %136, %142 : vector<2x32xf32>
    %144 = tpu.concatenate %143, %125 in 1 : vector<2x32xf32>, vector<2x32xf32> -> vector<2x64xf32>
    %cst_33 = arith.constant dense<0.000000e+00> : vector<2x128xf32>
    %145 = tpu.matmul %144, %7, %cst_33 {dimension_numbers = #tpu.dot_dimension_numbers<[1], [0], [0], [1], [0, 0, 1, 1], [], []>} : vector<2x64xf32>, vector<64x128xf32>, vector<2x128xf32> -> vector<2x128xf32>
    %146 = vector.broadcast %8 : vector<1x128xf32> to vector<2x128xf32>
    %147 = arith.addf %145, %146 : vector<2x128xf32>
    %148 = arith.negf %147 : vector<2x128xf32>
    %149 = math.exp %148 : vector<2x128xf32>
    %cst_34 = arith.constant 1.000000e+00 : f32
    %150 = vector.broadcast %cst_34 : f32 to vector<2x128xf32>
    %151 = arith.addf %150, %149 : vector<2x128xf32>
    %152 = arith.divf %150, %151 : vector<2x128xf32>
    %153 = vector.extract_strided_slice %152 {offsets = [0, 0], sizes = [2, 32], strides = [1, 1]} : vector<2x128xf32> to vector<2x32xf32>
    %154 = vector.extract_strided_slice %152 {offsets = [0, 32], sizes = [2, 32], strides = [1, 1]} : vector<2x128xf32> to vector<2x32xf32>
    %155 = vector.extract_strided_slice %152 {offsets = [0, 96], sizes = [2, 32], strides = [1, 1]} : vector<2x128xf32> to vector<2x32xf32>
    %156 = vector.extract_strided_slice %147 {offsets = [0, 64], sizes = [2, 32], strides = [1, 1]} : vector<2x128xf32> to vector<2x32xf32>
    %157 = math.tanh %156 : vector<2x32xf32>
    %158 = arith.mulf %154, %123 : vector<2x32xf32>
    %159 = arith.mulf %153, %157 : vector<2x32xf32>
    %160 = arith.addf %158, %159 : vector<2x32xf32>
    %161 = math.tanh %160 : vector<2x32xf32>
    %162 = arith.mulf %155, %161 : vector<2x32xf32>
    %163 = vector.extract_strided_slice %5 {offsets = [8, 0], sizes = [2, 128], strides = [1, 1]} : vector<16x128xf32> to vector<2x128xf32>
    %cst_35 = arith.constant dense<0.000000e+00> : vector<2x128xf32>
    %164 = tpu.matmul %143, %6, %cst_35 {dimension_numbers = #tpu.dot_dimension_numbers<[1], [0], [0], [1], [0, 0, 1, 1], [], []>} : vector<2x32xf32>, vector<32x128xf32>, vector<2x128xf32> -> vector<2x128xf32>
    %165 = arith.addf %163, %164 : vector<2x128xf32>
    %166 = arith.negf %165 : vector<2x128xf32>
    %167 = math.exp %166 : vector<2x128xf32>
    %cst_36 = arith.constant 1.000000e+00 : f32
    %168 = vector.broadcast %cst_36 : f32 to vector<2x128xf32>
    %169 = arith.addf %168, %167 : vector<2x128xf32>
    %170 = arith.divf %168, %169 : vector<2x128xf32>
    %171 = vector.extract_strided_slice %170 {offsets = [0, 0], sizes = [2, 32], strides = [1, 1]} : vector<2x128xf32> to vector<2x32xf32>
    %172 = vector.extract_strided_slice %170 {offsets = [0, 32], sizes = [2, 32], strides = [1, 1]} : vector<2x128xf32> to vector<2x32xf32>
    %173 = vector.extract_strided_slice %170 {offsets = [0, 96], sizes = [2, 32], strides = [1, 1]} : vector<2x128xf32> to vector<2x32xf32>
    %174 = vector.extract_strided_slice %165 {offsets = [0, 64], sizes = [2, 32], strides = [1, 1]} : vector<2x128xf32> to vector<2x32xf32>
    %175 = math.tanh %174 : vector<2x32xf32>
    %176 = arith.mulf %172, %141 : vector<2x32xf32>
    %177 = arith.mulf %171, %175 : vector<2x32xf32>
    %178 = arith.addf %176, %177 : vector<2x32xf32>
    %179 = math.tanh %178 : vector<2x32xf32>
    %180 = arith.mulf %173, %179 : vector<2x32xf32>
    %181 = tpu.concatenate %180, %162 in 1 : vector<2x32xf32>, vector<2x32xf32> -> vector<2x64xf32>
    %cst_37 = arith.constant dense<0.000000e+00> : vector<2x128xf32>
    %182 = tpu.matmul %181, %7, %cst_37 {dimension_numbers = #tpu.dot_dimension_numbers<[1], [0], [0], [1], [0, 0, 1, 1], [], []>} : vector<2x64xf32>, vector<64x128xf32>, vector<2x128xf32> -> vector<2x128xf32>
    %183 = vector.broadcast %8 : vector<1x128xf32> to vector<2x128xf32>
    %184 = arith.addf %182, %183 : vector<2x128xf32>
    %185 = arith.negf %184 : vector<2x128xf32>
    %186 = math.exp %185 : vector<2x128xf32>
    %cst_38 = arith.constant 1.000000e+00 : f32
    %187 = vector.broadcast %cst_38 : f32 to vector<2x128xf32>
    %188 = arith.addf %187, %186 : vector<2x128xf32>
    %189 = arith.divf %187, %188 : vector<2x128xf32>
    %190 = vector.extract_strided_slice %189 {offsets = [0, 0], sizes = [2, 32], strides = [1, 1]} : vector<2x128xf32> to vector<2x32xf32>
    %191 = vector.extract_strided_slice %189 {offsets = [0, 32], sizes = [2, 32], strides = [1, 1]} : vector<2x128xf32> to vector<2x32xf32>
    %192 = vector.extract_strided_slice %189 {offsets = [0, 96], sizes = [2, 32], strides = [1, 1]} : vector<2x128xf32> to vector<2x32xf32>
    %193 = vector.extract_strided_slice %184 {offsets = [0, 64], sizes = [2, 32], strides = [1, 1]} : vector<2x128xf32> to vector<2x32xf32>
    %194 = math.tanh %193 : vector<2x32xf32>
    %195 = arith.mulf %191, %160 : vector<2x32xf32>
    %196 = arith.mulf %190, %194 : vector<2x32xf32>
    %197 = arith.addf %195, %196 : vector<2x32xf32>
    %198 = math.tanh %197 : vector<2x32xf32>
    %199 = arith.mulf %192, %198 : vector<2x32xf32>
    %200 = vector.extract_strided_slice %5 {offsets = [10, 0], sizes = [2, 128], strides = [1, 1]} : vector<16x128xf32> to vector<2x128xf32>
    %cst_39 = arith.constant dense<0.000000e+00> : vector<2x128xf32>
    %201 = tpu.matmul %180, %6, %cst_39 {dimension_numbers = #tpu.dot_dimension_numbers<[1], [0], [0], [1], [0, 0, 1, 1], [], []>} : vector<2x32xf32>, vector<32x128xf32>, vector<2x128xf32> -> vector<2x128xf32>
    %202 = arith.addf %200, %201 : vector<2x128xf32>
    %203 = arith.negf %202 : vector<2x128xf32>
    %204 = math.exp %203 : vector<2x128xf32>
    %cst_40 = arith.constant 1.000000e+00 : f32
    %205 = vector.broadcast %cst_40 : f32 to vector<2x128xf32>
    %206 = arith.addf %205, %204 : vector<2x128xf32>
    %207 = arith.divf %205, %206 : vector<2x128xf32>
    %208 = vector.extract_strided_slice %207 {offsets = [0, 0], sizes = [2, 32], strides = [1, 1]} : vector<2x128xf32> to vector<2x32xf32>
    %209 = vector.extract_strided_slice %207 {offsets = [0, 32], sizes = [2, 32], strides = [1, 1]} : vector<2x128xf32> to vector<2x32xf32>
    %210 = vector.extract_strided_slice %207 {offsets = [0, 96], sizes = [2, 32], strides = [1, 1]} : vector<2x128xf32> to vector<2x32xf32>
    %211 = vector.extract_strided_slice %202 {offsets = [0, 64], sizes = [2, 32], strides = [1, 1]} : vector<2x128xf32> to vector<2x32xf32>
    %212 = math.tanh %211 : vector<2x32xf32>
    %213 = arith.mulf %209, %178 : vector<2x32xf32>
    %214 = arith.mulf %208, %212 : vector<2x32xf32>
    %215 = arith.addf %213, %214 : vector<2x32xf32>
    %216 = math.tanh %215 : vector<2x32xf32>
    %217 = arith.mulf %210, %216 : vector<2x32xf32>
    %218 = tpu.concatenate %217, %199 in 1 : vector<2x32xf32>, vector<2x32xf32> -> vector<2x64xf32>
    %cst_41 = arith.constant dense<0.000000e+00> : vector<2x128xf32>
    %219 = tpu.matmul %218, %7, %cst_41 {dimension_numbers = #tpu.dot_dimension_numbers<[1], [0], [0], [1], [0, 0, 1, 1], [], []>} : vector<2x64xf32>, vector<64x128xf32>, vector<2x128xf32> -> vector<2x128xf32>
    %220 = vector.broadcast %8 : vector<1x128xf32> to vector<2x128xf32>
    %221 = arith.addf %219, %220 : vector<2x128xf32>
    %222 = arith.negf %221 : vector<2x128xf32>
    %223 = math.exp %222 : vector<2x128xf32>
    %cst_42 = arith.constant 1.000000e+00 : f32
    %224 = vector.broadcast %cst_42 : f32 to vector<2x128xf32>
    %225 = arith.addf %224, %223 : vector<2x128xf32>
    %226 = arith.divf %224, %225 : vector<2x128xf32>
    %227 = vector.extract_strided_slice %226 {offsets = [0, 0], sizes = [2, 32], strides = [1, 1]} : vector<2x128xf32> to vector<2x32xf32>
    %228 = vector.extract_strided_slice %226 {offsets = [0, 32], sizes = [2, 32], strides = [1, 1]} : vector<2x128xf32> to vector<2x32xf32>
    %229 = vector.extract_strided_slice %226 {offsets = [0, 96], sizes = [2, 32], strides = [1, 1]} : vector<2x128xf32> to vector<2x32xf32>
    %230 = vector.extract_strided_slice %221 {offsets = [0, 64], sizes = [2, 32], strides = [1, 1]} : vector<2x128xf32> to vector<2x32xf32>
    %231 = math.tanh %230 : vector<2x32xf32>
    %232 = arith.mulf %228, %197 : vector<2x32xf32>
    %233 = arith.mulf %227, %231 : vector<2x32xf32>
    %234 = arith.addf %232, %233 : vector<2x32xf32>
    %235 = math.tanh %234 : vector<2x32xf32>
    %236 = arith.mulf %229, %235 : vector<2x32xf32>
    %237 = vector.extract_strided_slice %5 {offsets = [12, 0], sizes = [2, 128], strides = [1, 1]} : vector<16x128xf32> to vector<2x128xf32>
    %cst_43 = arith.constant dense<0.000000e+00> : vector<2x128xf32>
    %238 = tpu.matmul %217, %6, %cst_43 {dimension_numbers = #tpu.dot_dimension_numbers<[1], [0], [0], [1], [0, 0, 1, 1], [], []>} : vector<2x32xf32>, vector<32x128xf32>, vector<2x128xf32> -> vector<2x128xf32>
    %239 = arith.addf %237, %238 : vector<2x128xf32>
    %240 = arith.negf %239 : vector<2x128xf32>
    %241 = math.exp %240 : vector<2x128xf32>
    %cst_44 = arith.constant 1.000000e+00 : f32
    %242 = vector.broadcast %cst_44 : f32 to vector<2x128xf32>
    %243 = arith.addf %242, %241 : vector<2x128xf32>
    %244 = arith.divf %242, %243 : vector<2x128xf32>
    %245 = vector.extract_strided_slice %244 {offsets = [0, 0], sizes = [2, 32], strides = [1, 1]} : vector<2x128xf32> to vector<2x32xf32>
    %246 = vector.extract_strided_slice %244 {offsets = [0, 32], sizes = [2, 32], strides = [1, 1]} : vector<2x128xf32> to vector<2x32xf32>
    %247 = vector.extract_strided_slice %244 {offsets = [0, 96], sizes = [2, 32], strides = [1, 1]} : vector<2x128xf32> to vector<2x32xf32>
    %248 = vector.extract_strided_slice %239 {offsets = [0, 64], sizes = [2, 32], strides = [1, 1]} : vector<2x128xf32> to vector<2x32xf32>
    %249 = math.tanh %248 : vector<2x32xf32>
    %250 = arith.mulf %246, %215 : vector<2x32xf32>
    %251 = arith.mulf %245, %249 : vector<2x32xf32>
    %252 = arith.addf %250, %251 : vector<2x32xf32>
    %253 = math.tanh %252 : vector<2x32xf32>
    %254 = arith.mulf %247, %253 : vector<2x32xf32>
    %255 = tpu.concatenate %254, %236 in 1 : vector<2x32xf32>, vector<2x32xf32> -> vector<2x64xf32>
    %cst_45 = arith.constant dense<0.000000e+00> : vector<2x128xf32>
    %256 = tpu.matmul %255, %7, %cst_45 {dimension_numbers = #tpu.dot_dimension_numbers<[1], [0], [0], [1], [0, 0, 1, 1], [], []>} : vector<2x64xf32>, vector<64x128xf32>, vector<2x128xf32> -> vector<2x128xf32>
    %257 = vector.broadcast %8 : vector<1x128xf32> to vector<2x128xf32>
    %258 = arith.addf %256, %257 : vector<2x128xf32>
    %259 = arith.negf %258 : vector<2x128xf32>
    %260 = math.exp %259 : vector<2x128xf32>
    %cst_46 = arith.constant 1.000000e+00 : f32
    %261 = vector.broadcast %cst_46 : f32 to vector<2x128xf32>
    %262 = arith.addf %261, %260 : vector<2x128xf32>
    %263 = arith.divf %261, %262 : vector<2x128xf32>
    %264 = vector.extract_strided_slice %263 {offsets = [0, 0], sizes = [2, 32], strides = [1, 1]} : vector<2x128xf32> to vector<2x32xf32>
    %265 = vector.extract_strided_slice %263 {offsets = [0, 32], sizes = [2, 32], strides = [1, 1]} : vector<2x128xf32> to vector<2x32xf32>
    %266 = vector.extract_strided_slice %263 {offsets = [0, 96], sizes = [2, 32], strides = [1, 1]} : vector<2x128xf32> to vector<2x32xf32>
    %267 = vector.extract_strided_slice %258 {offsets = [0, 64], sizes = [2, 32], strides = [1, 1]} : vector<2x128xf32> to vector<2x32xf32>
    %268 = math.tanh %267 : vector<2x32xf32>
    %269 = arith.mulf %265, %234 : vector<2x32xf32>
    %270 = arith.mulf %264, %268 : vector<2x32xf32>
    %271 = arith.addf %269, %270 : vector<2x32xf32>
    %272 = math.tanh %271 : vector<2x32xf32>
    %273 = arith.mulf %266, %272 : vector<2x32xf32>
    %274 = vector.extract_strided_slice %5 {offsets = [14, 0], sizes = [2, 128], strides = [1, 1]} : vector<16x128xf32> to vector<2x128xf32>
    %cst_47 = arith.constant dense<0.000000e+00> : vector<2x128xf32>
    %275 = tpu.matmul %254, %6, %cst_47 {dimension_numbers = #tpu.dot_dimension_numbers<[1], [0], [0], [1], [0, 0, 1, 1], [], []>} : vector<2x32xf32>, vector<32x128xf32>, vector<2x128xf32> -> vector<2x128xf32>
    %276 = arith.addf %274, %275 : vector<2x128xf32>
    %277 = arith.negf %276 : vector<2x128xf32>
    %278 = math.exp %277 : vector<2x128xf32>
    %cst_48 = arith.constant 1.000000e+00 : f32
    %279 = vector.broadcast %cst_48 : f32 to vector<2x128xf32>
    %280 = arith.addf %279, %278 : vector<2x128xf32>
    %281 = arith.divf %279, %280 : vector<2x128xf32>
    %282 = vector.extract_strided_slice %281 {offsets = [0, 0], sizes = [2, 32], strides = [1, 1]} : vector<2x128xf32> to vector<2x32xf32>
    %283 = vector.extract_strided_slice %281 {offsets = [0, 32], sizes = [2, 32], strides = [1, 1]} : vector<2x128xf32> to vector<2x32xf32>
    %284 = vector.extract_strided_slice %281 {offsets = [0, 96], sizes = [2, 32], strides = [1, 1]} : vector<2x128xf32> to vector<2x32xf32>
    %285 = vector.extract_strided_slice %276 {offsets = [0, 64], sizes = [2, 32], strides = [1, 1]} : vector<2x128xf32> to vector<2x32xf32>
    %286 = math.tanh %285 : vector<2x32xf32>
    %287 = arith.mulf %283, %252 : vector<2x32xf32>
    %288 = arith.mulf %282, %286 : vector<2x32xf32>
    %289 = arith.addf %287, %288 : vector<2x32xf32>
    %290 = math.tanh %289 : vector<2x32xf32>
    %291 = arith.mulf %284, %290 : vector<2x32xf32>
    %292 = tpu.concatenate %291, %273 in 1 : vector<2x32xf32>, vector<2x32xf32> -> vector<2x64xf32>
    %cst_49 = arith.constant dense<0.000000e+00> : vector<2x128xf32>
    %293 = tpu.matmul %292, %7, %cst_49 {dimension_numbers = #tpu.dot_dimension_numbers<[1], [0], [0], [1], [0, 0, 1, 1], [], []>} : vector<2x64xf32>, vector<64x128xf32>, vector<2x128xf32> -> vector<2x128xf32>
    %294 = vector.broadcast %8 : vector<1x128xf32> to vector<2x128xf32>
    %295 = arith.addf %293, %294 : vector<2x128xf32>
    %296 = arith.negf %295 : vector<2x128xf32>
    %297 = math.exp %296 : vector<2x128xf32>
    %cst_50 = arith.constant 1.000000e+00 : f32
    %298 = vector.broadcast %cst_50 : f32 to vector<2x128xf32>
    %299 = arith.addf %298, %297 : vector<2x128xf32>
    %300 = arith.divf %298, %299 : vector<2x128xf32>
    %301 = vector.extract_strided_slice %300 {offsets = [0, 0], sizes = [2, 32], strides = [1, 1]} : vector<2x128xf32> to vector<2x32xf32>
    %302 = vector.extract_strided_slice %300 {offsets = [0, 32], sizes = [2, 32], strides = [1, 1]} : vector<2x128xf32> to vector<2x32xf32>
    %303 = vector.extract_strided_slice %300 {offsets = [0, 96], sizes = [2, 32], strides = [1, 1]} : vector<2x128xf32> to vector<2x32xf32>
    %304 = vector.extract_strided_slice %295 {offsets = [0, 64], sizes = [2, 32], strides = [1, 1]} : vector<2x128xf32> to vector<2x32xf32>
    %305 = math.tanh %304 : vector<2x32xf32>
    %306 = arith.mulf %302, %271 : vector<2x32xf32>
    %307 = arith.mulf %301, %305 : vector<2x32xf32>
    %308 = arith.addf %306, %307 : vector<2x32xf32>
    %309 = math.tanh %308 : vector<2x32xf32>
    %310 = arith.mulf %303, %309 : vector<2x32xf32>
    %311 = tpu.concatenate %51, %88, %125, %162, %199, %236, %273, %310 in 0 : vector<2x32xf32>, vector<2x32xf32>, vector<2x32xf32>, vector<2x32xf32>, vector<2x32xf32>, vector<2x32xf32>, vector<2x32xf32>, vector<2x32xf32> -> vector<16x32xf32>
    %cst_51 = arith.constant dense<0.000000e+00> : vector<16x128xf32>
    %312 = tpu.matmul %311, %9, %cst_51 {dimension_numbers = #tpu.dot_dimension_numbers<[1], [0], [0], [1], [0, 0, 1, 1], [], []>} : vector<16x32xf32>, vector<32x128xf32>, vector<16x128xf32> -> vector<16x128xf32>
    %313 = vector.broadcast %10 : vector<1x128xf32> to vector<16x128xf32>
    %314 = arith.addf %312, %313 : vector<16x128xf32>
    %c0_52 = arith.constant 0 : index
    %c0_53 = arith.constant 0 : index
    %315 = vector.load %arg8[%c0_52, %c0_53] : memref<16x128xf32, #tpu.memory_space<vmem>>, vector<16x128xf32>
    tpu.vector_store %arg8[%c0_52, %c0_53], %314 {strides = array<i32>} : memref<16x128xf32, #tpu.memory_space<vmem>>, vector<16x128xf32>,
    return
  }
}

</mosaic_0001>

<bundles_post_ra>
// kernel: tpu_custom_call.1
= control target key start
LH: loop header
LB: loop body
LE: loop exit
PB: predicated region body
PF: predicated region fallthrough
CT: control target
= control target key end

     0   :  { %13 = vsyncpa [#allocation3], 0  ;;  %s2107_s0 = inlined_call_operand.hbm [shape: f32[16,16], index: 0, kind: input, shape index: {}]   ;;  %s2108_s1 = inlined_call_operand.hbm [shape: f32[16,128], index: 1, kind: input, shape index: {}]   ;;  %s2109_s2 = inlined_call_operand.vmem [shape: f32[1,128], index: 2, kind: input, shape index: {}]   ;;  %s2110_s3 = inlined_call_operand.hbm [shape: f32[32,128], index: 3, kind: input, shape index: {}]   ;;  %s2111_s4 = inlined_call_operand.hbm [shape: f32[64,128], index: 4, kind: input, shape index: {}]   ;;  %s2112_s5 = inlined_call_operand.vmem [shape: f32[1,128], index: 5, kind: input, shape index: {}]   ;;  %s2113_s6 = inlined_call_operand.hbm [shape: f32[32,128], index: 6, kind: input, shape index: {}]   ;;  %s2114_s7 = inlined_call_operand.vmem [shape: f32[1,128], index: 7, kind: input, shape index: {}]   ;;  %s2115_s8 = inlined_call_operand.hbm [shape: f32[16,128], index: 8, kind: output, shape index: {}]  }
   0x1   :  { %14 = vsyncpa [#allocation6], 0 }
   0x2   :  { %15 = vsyncpa [#allocation9], 0 }
   0x3   :  { %16 = vsyncpa [#allocation4], 0  ;;  %s34_s29 = sshll.u32 %s2108_s1, 4  ;;  %s1675_s30 = smov [#allocation5]   ;;  %s35_s29 = int_to_ptr.hbm [resolvable:$true] %s34_s29 }
   0x4   :  { %s36_s9 = sshll.u32 %s1675_s30, 4  ;;  %s62_s12 = sshll.u32 %s2111_s4, 4  ;;  %s37_s9 = int_to_ptr.vmem [resolvable:$true] %s36_s9  ;;  %s63_s12 = int_to_ptr.hbm [resolvable:$true] %s62_s12 }
   0x5   :  { %s1676_s13 = smov 128   ;;  %s1677_s14 = smov 8  }
   0x6   :  { %42 = dma.hbm_to_vmem [thread:$0]  %s35_s29, 256, %s37_s9, [#allocation6], %s1676_s13, %s1676_s13, %s1677_s14  }
   0x7   :  { %s1678_s15 = smov [#allocation8]   ;;  %s21_s1 = sshll.u32 %s2107_s0, 4  ;;  %s22_s1 = int_to_ptr.hbm [resolvable:$true] %s21_s1 }
   0x8   :  { %s64_s16 = sshll.u32 %s1678_s15, 4  ;;  %s49_s20 = sshll.u32 %s2110_s3, 4  ;;  %s65_s16 = int_to_ptr.vmem [resolvable:$true] %s64_s16  ;;  %s50_s20 = int_to_ptr.hbm [resolvable:$true] %s49_s20 }
   0x9   :  { %70 = dma.hbm_to_vmem [thread:$0]  %s63_s12, 1024, %s65_s16, [#allocation9], %s1676_s13, %s1676_s13, %s1677_s14  }
   0xa   :  { %s1679_s21 = smov [#allocation2]   ;;  %s1680_s23 = smov [#allocation7]  }
   0xb   :  { %s23_s22 = sshll.u32 %s1679_s21, 4  ;;  %s51_s0 = sshll.u32 %s1680_s23, 4  ;;  %s24_s22 = int_to_ptr.vmem [resolvable:$true] %s23_s22  ;;  %s52_s0 = int_to_ptr.vmem [resolvable:$true] %s51_s0 }
   0xc   :  { %29 = dma.hbm_to_vmem [thread:$0]  %s22_s1, 256, %s24_s22, [#allocation3], %s1676_s13, %s1676_s13, %s1677_s14  }
   0xd   :  { %s77_s26 = sshll.u32 %s2113_s6, 4  ;;  %s1681_s3 = smov [#allocation10]   ;;  %s78_s26 = int_to_ptr.hbm [resolvable:$true] %s77_s26 }
   0xe   :  { %57 = dma.hbm_to_vmem [thread:$0]  %s50_s20, 512, %s52_s0, [#allocation6], %s1676_s13, %s1676_s13, %s1677_s14  }
   0xf   :  { %s79_s27 = sshll.u32 %s1681_s3, 4  ;;  %s80_s27 = int_to_ptr.vmem [resolvable:$true] %s79_s27 }
  0x10   :  { %85 = dma.hbm_to_vmem [thread:$0]  %s78_s26, 512, %s80_s27, [#allocation9], %s1676_s13, %s1676_s13, %s1677_s14  }
  0x11   :  { %1667 = dma.done.wait [#allocation3], 256  }
  0x12   :  { %1668 = vsyncadd [#allocation3], 4294967040 }
  0x13   :  { %1669 = dma.done.wait [#allocation6], 768  }
  0x14   :  { %1670 = vsyncadd [#allocation6], 4294966528 }
  0x15   :  { %1671 = dma.done.wait [#allocation9], 1536  }
  0x16   :  { %1672 = vsyncadd [#allocation9], 4294965760  ;;  %v1761_v0 = vld [vmem:[#allocation7 + $0x18] sm:$0xff]  ;;  %v1763_v2 = vld [vmem:[#allocation7 + $0x10] sm:$0xff]  ;;  %vm116_vm0 = vcmask 130048   ;;  %v1682_v7 = vmov 0.0  }
  0x17   :  { %v111_v1 = vld [vmem:[#allocation5 + $0x8] sm:$0xff]  ;;  %180 = vmatpush.msra.mxu1 %v1761_v0  ;;  %v110_v3 = vld [vmem:[#allocation5] sm:$0xff]  ;;  %v108_v4 = vld [vmem:[#allocation2] sm:$0xff]  ;;  %309 = vmatpush.msra.mxu3 %v1761_v0  ;;  %s1683_s29 = smov 64   ;;  %vm164_vm5 = vcmask 261120   ;;  %vm234_vm6 = vcmask 523264  }
  0x18   :  { %137 = vmatpush.msra.mxu0 %v111_v1  ;;  %v1766_v5 = vld [vmem:[#allocation7 + $0x8] sm:$0xff]  ;;  %v1771_v6 = vld [vmem:[#allocation7] sm:$0xff]  ;;  %v1801_v33 = vld [vmem:[#allocation8 + $0x38] sm:$0xff]  ;;  %s1685_s15 = smov [#allocation11]   ;;  %s1330_s1 = sshll.u32 %s2115_s8, 4  ;;  %s1331_s1 = int_to_ptr.hbm [resolvable:$true] %s1330_s1 }
  0x19   :  { %181 = vmatpush.msra.mxu1 %v1763_v2  ;;  %310 = vmatpush.msra.mxu3 %v1763_v2  ;;  %v1789_v8 = vld [vmem:[%s2109_s2] ss:$0 sm:$0xff]  ;;  %s1684_s2 = smov 32   ;;  %v1803_v34 = vld [vmem:[#allocation8 + $0x30] sm:$0xff]  ;;  %v1807_v35 = vld [vmem:[#allocation8 + $0x28] sm:$0xff]  ;;  %s1328_s16 = sshll.u32 %s1685_s15, 4  ;;  %s1329_s16 = int_to_ptr.vmem [resolvable:$true] %s1328_s16 }
  0x1a   :  { %138 = vmatpush.msra.mxu0 %v110_v3  ;;  %246 = vmatpush.msra.mxu2 %v1801_v33  ;;  %v1812_v36 = vld [vmem:[#allocation8 + $0x20] sm:$0xff]  ;;  %v1817_v37 = vld [vmem:[#allocation8 + $0x18] sm:$0xff]  ;;  %v1822_v38 = vld [vmem:[#allocation8 + $0x10] sm:$0xff] }
  0x1b   :  { %1345 = vmatmul.msk.f32.vlgmr.msra.gmra.mxu0 %vm116_vm0, %v108_v4  ;;  %182 = vmatpush.msra.mxu1 %v1766_v5  ;;  %v1827_v39 = vld [vmem:[#allocation8 + $0x8] sm:$0xff]  ;;  %v1837_v42 = vld [vmem:[#allocation8] sm:$0xff] }
  0x1c   :  { %311 = vmatpush.msra.mxu3 %v1766_v5  ;;  %383 = vmatpush.msrb.mxu0 %v1801_v33  ;;  %v1872_v45 = vld [vmem:[%s2112_s5] ss:$0 sm:$0xff] }
  0x1d   :  { %183 = vmatpush.msra.mxu1 %v1771_v6  ;;  %247 = vmatpush.msra.mxu2 %v1803_v34 }
  0x1e   :  { %184 = vmatmul.f32.vlgmr.msra.gmra.mxu1 %v1682_v7  ;;  %312 = vmatpush.msra.mxu3 %v1771_v6 }
  0x1f   :  { %449 = vmatpush.msrb.mxu1 %v1761_v0  ;;  %384 = vmatpush.msrb.mxu0 %v1803_v34 }
  0x20   :  { %523 = vmatpush.msrb.mxu3 %v1801_v33  ;;  %248 = vmatpush.msra.mxu2 %v1807_v35 }
  0x21   :  { %450 = vmatpush.msrb.mxu1 %v1763_v2  ;;  %385 = vmatpush.msrb.mxu0 %v1807_v35 }
  0x22   :  { %524 = vmatpush.msrb.mxu3 %v1803_v34  ;;  %249 = vmatpush.msra.mxu2 %v1812_v36 }
  0x23   :  { %451 = vmatpush.msrb.mxu1 %v1766_v5  ;;  %386 = vmatpush.msrb.mxu0 %v1812_v36 }
  0x24   :  { %525 = vmatpush.msrb.mxu3 %v1807_v35  ;;  %250 = vmatpush.msra.mxu2 %v1817_v37 }
  0x25   :  { %452 = vmatpush.msrb.mxu1 %v1771_v6  ;;  %387 = vmatpush.msrb.mxu0 %v1817_v37 }
  0x26   :  { %526 = vmatpush.msrb.mxu3 %v1812_v36  ;;  %251 = vmatpush.msra.mxu2 %v1822_v38 }
  0x27   :  { %589 = vmatpush.msra.mxu1 %v1761_v0  ;;  %388 = vmatpush.msrb.mxu0 %v1822_v38 }
  0x28   :  { %527 = vmatpush.msrb.mxu3 %v1817_v37  ;;  %252 = vmatpush.msra.mxu2 %v1827_v39 }
  0x29   :  { %590 = vmatpush.msra.mxu1 %v1763_v2  ;;  %389 = vmatpush.msrb.mxu0 %v1827_v39 }
  0x2a   :  { %528 = vmatpush.msrb.mxu3 %v1822_v38  ;;  %253 = vmatpush.msra.mxu2 %v1837_v42 }
  0x2b   :  { %591 = vmatpush.msra.mxu1 %v1766_v5  ;;  %390 = vmatpush.msrb.mxu0 %v1837_v42 }
  0x2c   :  { %529 = vmatpush.msrb.mxu3 %v1827_v39  ;;  %663 = vmatpush.msrb.mxu2 %v1801_v33 }
  0x2d   :  { %592 = vmatpush.msra.mxu1 %v1771_v6  ;;  %935 = vmatpush.msra.mxu0 %v1801_v33 }
  0x2e   :  { %530 = vmatpush.msrb.mxu3 %v1837_v42  ;;  %664 = vmatpush.msrb.mxu2 %v1803_v34 }
  0x2f   :  { %936 = vmatpush.msra.mxu0 %v1803_v34 }
  0x30   :  { %665 = vmatpush.msrb.mxu2 %v1807_v35 }
  0x31   :  { %937 = vmatpush.msra.mxu0 %v1807_v35 }
  0x32   :  { %666 = vmatpush.msrb.mxu2 %v1812_v36 }
  0x33   :  { %938 = vmatpush.msra.mxu0 %v1812_v36 }
  0x34   :  { %667 = vmatpush.msrb.mxu2 %v1817_v37 }
  0x35   :  { %939 = vmatpush.msra.mxu0 %v1817_v37 }
  0x36   :  { %668 = vmatpush.msrb.mxu2 %v1822_v38 }
  0x37   :  { %940 = vmatpush.msra.mxu0 %v1822_v38 }
  0x38   :  { %669 = vmatpush.msrb.mxu2 %v1827_v39 }
  0x39   :  { %941 = vmatpush.msra.mxu0 %v1827_v39 }
  0x3a   :  { %670 = vmatpush.msrb.mxu2 %v1837_v42 }
  0x3b   :  { %942 = vmatpush.msra.mxu0 %v1837_v42 }
  0x98   :  { %v140_v9 = vpop.f32.mrf.mxu0 }
  0x99   :  { %v1792_v10 = vadd.f32 %v1789_v8, %v140_v9 }
  0x9b   :  { %v185_v11 = vpop.f32.mrf.mxu1 }
  0x9c   :  { %v188_v12 = vadd.f32 %v185_v11, %v1792_v10 }
  0x9e   :  { %1394 = vtanh.f32 %v188_v12  ;;  %v1347_v14 = vmul.f32 -1.442695, %v188_v12 }
  0xa0   :  { %1396 = vpow2.f32 %v1347_v14 }
  0xa4   :  { %v1395_v13 = vpop.eup %1394 }
  0xa5   :  { %211 = vrot.lane.b32.xlu0 %v1395_v13, %s1683_s29 }
  0xa6   :  { %v1397_v15 = vpop.eup %1396 }
  0xa7   :  { %v192_v16 = vadd.f32 1.0, %v1397_v15 }
  0xa9   :  { %1398 = vrcp.f32 %v192_v16  ;;  %v204_v22 = vand.u32 2147483648, %v192_v16  ;;  %vm198_vm2 = vweird.f32 %v192_v16  ;;  %v202_v23 = vand.u32 2147483647, %v192_v16 }
  0xab   :  { %v205_v25 = vor.u32 1.1754944e-38, %v204_v22  ;;  %vm203_vm4 = vcmp.eq.f32.partialorder %v202_v23, 8.507059e+37 }
  0xaf   :  { %v1399_v17 = vpop.eup %1398 }
  0xb0   :  { %v194_v18 = vmul.f32 %v1399_v17, %v192_v16  ;;  %vm199_vm1 = vweird.f32 %v1399_v17 }
  0xb1   :  { %vm200_vm3 = vmor %vm198_vm2, %vm199_vm1 }
  0xb2   :  { %v195_v19 = vsub.f32 1.0, %v194_v18 }
  0xb4   :  { %v196_v20 = vmul.f32 %v1399_v17, %v195_v19 }
  0xb6   :  { %v197_v21 = vadd.f32 %v1399_v17, %v196_v20 }
  0xb8   :  { %v201_v24 = vsel %vm200_vm3, %v1399_v17, %v197_v21 }
  0xb9   :  { %v206_v27 = vsel %vm203_vm4, %v205_v25, %v201_v24 }
  0xba   :  { %v209_v29 = vmul.f32 0.0, %v206_v27 }
 0x117   :  { %v212_v26 = vpop.permute.xlu0 %211 }
 0x118   :  { %v214_v28 = vmul.f32 %v212_v26, %v206_v27 }
 0x11a   :  { %216 = vrot.lane.b32.xlu0 %v214_v28, %s1684_s2 }
 0x18c   :  { %v217_v30 = vpop.permute.xlu0 %216 }
 0x18d   :  { %v1797_v31 = vadd.f32 %v217_v30, %v209_v29 }
 0x18f   :  { %1400 = vtanh.f32 %v1797_v31  ;;  %v342_v28 = vrot.slane %v1797_v31, 6 }
 0x195   :  { %v1401_v32 = vpop.eup %1400 }
 0x196   :  { %222 = vrot.lane.b32.xlu1 %v1401_v32, %s1683_s29 }
 0x208   :  { %v223_v40 = vpop.permute.xlu1 %222 }
 0x209   :  { %v225_v41 = vmul.f32 %v223_v40, %v206_v27 }
 0x20b   :  { %227 = vrot.lane.b32.xlu1 %v225_v41, %s1684_s2 }
 0x27d   :  { %v228_v43 = vpop.permute.xlu1 %227 }
 0x27e   :  { %1350 = vmatmul.msk.f32.vlgmr.msra.gmra.mxu3 %vm164_vm5, %v228_v43  ;;  %v230_v44 = vsel %vm164_vm5, %v228_v43, 0.0 }
 0x27f   :  { %1348 = vmatmul.msk.f32.vlgmr.msra.gmra.mxu2 %vm234_vm6, %v230_v44  ;;  %861 = vmatpush.msra.mxu3 %v1761_v0 }
 0x280   :  { %1001 = vmatpush.msra.mxu2 %v1761_v0 }
 0x281   :  { %862 = vmatpush.msra.mxu3 %v1763_v2 }
 0x282   :  { %1002 = vmatpush.msra.mxu2 %v1763_v2 }
 0x283   :  { %863 = vmatpush.msra.mxu3 %v1766_v5 }
 0x284   :  { %1003 = vmatpush.msra.mxu2 %v1766_v5 }
 0x285   :  { %864 = vmatpush.msra.mxu3 %v1771_v6 }
 0x286   :  { %1004 = vmatpush.msra.mxu2 %v1771_v6 }
 0x301   :  { %v314_v46 = vpop.f32.mrf.mxu3 }
 0x302   :  { %v255_v47 = vpop.f32.mrf.mxu2  ;;  %v318_v49 = vrot.slane %v314_v46, 6 }
 0x303   :  { %v256_v48 = vadd.f32 %v1872_v45, %v255_v47 }
 0x304   :  { %v320_v50 = vadd.f32 %v318_v49, %v1792_v10  ;;  %v109_v49 = vld [vmem:[#allocation2 + $0x8] sm:$0xff] }
 0x305   :  { %1402 = vtanh.f32 %v256_v48  ;;  %v1349_v53 = vmul.f32 -1.442695, %v256_v48  ;;  %1346 = vmatmul.msk.f32.gmra.mxu0 %vm116_vm0, %v109_v49 }
 0x306   :  { %1404 = vtanh.f32 %v320_v50  ;;  %v1351_v54 = vmul.f32 -1.442695, %v320_v50 }
 0x307   :  { %1406 = vpow2.f32 %v1349_v53 }
 0x308   :  { %1408 = vpow2.f32 %v1351_v54 }
 0x30b   :  { %v1403_v51 = vpop.eup %1402 }
 0x30c   :  { %280 = vrot.lane.b32.xlu2 %v1403_v51, %s1683_s29  ;;  %v1405_v52 = vpop.eup %1404 }
 0x30d   :  { %v1407_v55 = vpop.eup %1406 }
 0x30e   :  { %v261_v56 = vadd.f32 1.0, %v1407_v55  ;;  %v1409_v57 = vpop.eup %1408 }
 0x30f   :  { %v324_v58 = vadd.f32 1.0, %v1409_v57 }
 0x310   :  { %1410 = vrcp.f32 %v261_v56  ;;  %v273_v7 = vand.u32 2147483648, %v261_v56  ;;  %vm267_vm8 = vweird.f32 %v261_v56  ;;  %v271_v9 = vand.u32 2147483647, %v261_v56 }
 0x311   :  { %1412 = vrcp.f32 %v324_v58  ;;  %v336_v18 = vand.u32 2147483648, %v324_v58  ;;  %vm330_vm12 = vweird.f32 %v324_v58  ;;  %v334_v19 = vand.u32 2147483647, %v324_v58 }
 0x312   :  { %v274_v13 = vor.u32 1.1754944e-38, %v273_v7  ;;  %vm272_vm10 = vcmp.eq.f32.partialorder %v271_v9, 8.507059e+37 }
 0x313   :  { %v337_v21 = vor.u32 1.1754944e-38, %v336_v18  ;;  %vm335_vm14 = vcmp.eq.f32.partialorder %v334_v19, 8.507059e+37 }
 0x314   :  { %346 = vrot.lane.b32.xlu2 %v1405_v52, %s1683_s29 }
 0x316   :  { %v1411_v59 = vpop.eup %1410 }
 0x317   :  { %v263_v60 = vmul.f32 %v1411_v59, %v261_v56  ;;  %v1413_v62 = vpop.eup %1412  ;;  %vm268_vm7 = vweird.f32 %v1411_v59 }
 0x318   :  { %v326_v1 = vmul.f32 %v1413_v62, %v324_v58  ;;  %vm269_vm9 = vmor %vm267_vm8, %vm268_vm7  ;;  %vm331_vm11 = vweird.f32 %v1413_v62 }
 0x319   :  { %v264_v61 = vsub.f32 1.0, %v263_v60  ;;  %vm332_vm13 = vmor %vm330_vm12, %vm331_vm11 }
 0x31a   :  { %v327_v4 = vsub.f32 1.0, %v326_v1 }
 0x31b   :  { %v265_v63 = vmul.f32 %v1411_v59, %v264_v61 }
 0x31c   :  { %v328_v12 = vmul.f32 %v1413_v62, %v327_v4 }
 0x31d   :  { %v266_v3 = vadd.f32 %v1411_v59, %v265_v63 }
 0x31e   :  { %v329_v17 = vadd.f32 %v1413_v62, %v328_v12 }
 0x31f   :  { %v270_v11 = vsel %vm269_vm9, %v1411_v59, %v266_v3 }
 0x320   :  { %v275_v15 = vsel %vm272_vm10, %v274_v13, %v270_v11  ;;  %v333_v20 = vsel %vm332_vm13, %v1413_v62, %v329_v17 }
 0x321   :  { %v338_v22 = vsel %vm335_vm14, %v337_v21, %v333_v20  ;;  %v278_v25 = vmul.f32 0.0, %v275_v15 }
 0x322   :  { %v344_v29 = vmul.f32 %v342_v28, %v338_v22 }
 0x366   :  { %v281_v14 = vpop.permute.xlu2 %280 }
 0x367   :  { %v283_v16 = vmul.f32 %v281_v14, %v275_v15 }
 0x369   :  { %285 = vrot.lane.b32.xlu0 %v283_v16, %s1684_s2 }
 0x36e   :  { %v347_v23 = vpop.permute.xlu2 %346 }
 0x36f   :  { %v349_v24 = vmul.f32 %v347_v23, %v338_v22 }
 0x371   :  { %351 = vrot.lane.b32.xlu1 %v349_v24, %s1684_s2 }
 0x382   :  { %v1903_v55 = vpop.f32.mrf.mxu0 }
 0x3db   :  { %v286_v26 = vpop.permute.xlu0 %285 }
 0x3dc   :  { %v1880_v27 = vadd.f32 %v286_v26, %v278_v25 }
 0x3de   :  { %1414 = vtanh.f32 %v1880_v27 }
 0x3e3   :  { %v352_v30 = vpop.permute.xlu1 %351 }
 0x3e4   :  { %v1415_v32 = vpop.eup %1414  ;;  %v1884_v40 = vadd.f32 %v352_v30, %v344_v29 }
 0x3e5   :  { %291 = vrot.lane.b32.xlu2 %v1415_v32, %s1683_s29 }
 0x3e6   :  { %1416 = vtanh.f32 %v1884_v40 }
 0x3ec   :  { %v1417_v41 = vpop.eup %1416 }
 0x3ed   :  { %357 = vrot.lane.b32.xlu0 %v1417_v41, %s1683_s29 }
 0x43f   :  { %v292_v43 = vpop.permute.xlu2 %291 }
 0x440   :  { %v1889_v44 = vmul.f32 %v292_v43, %v275_v15 }
 0x442   :  { %v366_v46 = vrot.slane %v1889_v44, 6 }
 0x444   :  { %367 = vrot.lane.b32.xlu2 %v366_v46, %s1683_s29 }
 0x45f   :  { %v358_v31 = vpop.permute.xlu0 %357 }
 0x460   :  { %v360_v47 = vmul.f32 %v358_v31, %v338_v22 }
 0x462   :  { %v432_v48 = vrot.slane %v360_v47, 2  ;;  %362 = vrot.lane.b32.xlu1 %v360_v47, %s1684_s2  ;;  %v482_v47 = vrot.slane %v1884_v40, 6 }
 0x464   :  { %433 = vrot.lane.b32.xlu0 %v432_v48, %s1684_s2 }
 0x49e   :  { %v368_v50 = vpop.permute.xlu2 %367 }
 0x4d4   :  { %v363_v51 = vpop.permute.xlu1 %362 }
 0x4d5   :  { %v370_v52 = vsel %vm164_vm5, %v363_v51, %v368_v50 }
 0x4d6   :  { %v372_v53 = vrot.slane %v370_v52, 2  ;;  %v434_v54 = vpop.permute.xlu0 %433 }
 0x4d7   :  { %1354 = vmatmul.msk.f32.vlgmr.msrb.gmra.mxu1 %vm164_vm5, %v434_v54 }
 0x4d8   :  { %1352 = vmatmul.msk.f32.vlgmr.msrb.gmra.mxu0 %vm234_vm6, %v372_v53  ;;  %729 = vmatpush.msrb.mxu1 %v1761_v0 }
 0x4da   :  { %730 = vmatpush.msrb.mxu1 %v1763_v2 }
 0x4dc   :  { %731 = vmatpush.msrb.mxu1 %v1766_v5 }
 0x4de   :  { %732 = vmatpush.msrb.mxu1 %v1771_v6 }
 0x554   :  { %v454_v56 = vpop.f32.mrf.mxu1 }
 0x555   :  { %v458_v57 = vrot.slane %v454_v56, 4  ;;  %v392_v58 = vpop.f32.mrf.mxu0 }
 0x556   :  { %v393_v59 = vadd.f32 %v1872_v45, %v392_v58 }
 0x557   :  { %v460_v60 = vadd.f32 %v458_v57, %v1792_v10 }
 0x558   :  { %1418 = vtanh.f32 %v393_v59  ;;  %v1353_v7 = vmul.f32 -1.442695, %v393_v59 }
 0x559   :  { %1420 = vtanh.f32 %v460_v60  ;;  %v1355_v63 = vmul.f32 -1.442695, %v460_v60 }
 0x55b   :  { %1422 = vpow2.f32 %v1355_v63 }
 0x55e   :  { %v1419_v61 = vpop.eup %1418 }
 0x55f   :  { %v1421_v62 = vpop.eup %1420  ;;  %417 = vrot.lane.b32.xlu1 %v1419_v61, %s1683_s29 }
 0x560   :  { %486 = vrot.lane.b32.xlu2 %v1421_v62, %s1683_s29 }
 0x561   :  { %v1423_v1 = vpop.eup %1422 }
 0x562   :  { %v464_v3 = vadd.f32 1.0, %v1423_v1 }
 0x564   :  { %1424 = vrcp.f32 %v464_v3  ;;  %v476_v16 = vand.u32 2147483648, %v464_v3  ;;  %vm470_vm0 = vweird.f32 %v464_v3  ;;  %v474_v17 = vand.u32 2147483647, %v464_v3 }
 0x565   :  { %1426 = vpow2.f32 %v1353_v7 }
 0x566   :  { %v477_v19 = vor.u32 1.1754944e-38, %v476_v16  ;;  %vm475_vm2 = vcmp.eq.f32.partialorder %v474_v17, 8.507059e+37 }
 0x56a   :  { %v1425_v4 = vpop.eup %1424 }
 0x56b   :  { %v466_v9 = vmul.f32 %v1425_v4, %v464_v3  ;;  %v1427_v12 = vpop.eup %1426  ;;  %vm471_vm15 = vweird.f32 %v1425_v4 }
 0x56c   :  { %v398_v14 = vadd.f32 1.0, %v1427_v12  ;;  %vm472_vm1 = vmor %vm470_vm0, %vm471_vm15 }
 0x56d   :  { %v467_v11 = vsub.f32 1.0, %v466_v9 }
 0x56e   :  { %1428 = vrcp.f32 %v398_v14  ;;  %v410_v29 = vand.u32 2147483648, %v398_v14  ;;  %vm404_vm4 = vweird.f32 %v398_v14  ;;  %v408_v30 = vand.u32 2147483647, %v398_v14 }
 0x56f   :  { %v468_v13 = vmul.f32 %v1425_v4, %v467_v11 }
 0x570   :  { %v411_v41 = vor.u32 1.1754944e-38, %v410_v29  ;;  %vm409_vm8 = vcmp.eq.f32.partialorder %v408_v30, 8.507059e+37 }
 0x571   :  { %v469_v15 = vadd.f32 %v1425_v4, %v468_v13 }
 0x573   :  { %v473_v18 = vsel %vm472_vm1, %v1425_v4, %v469_v15  ;;  %vm1277_vm1 = vcmask 1041408  }
 0x574   :  { %v478_v20 = vsel %vm475_vm2, %v477_v19, %v473_v18  ;;  %v1429_v22 = vpop.eup %1428  ;;  %vm1279_vm2 = vcmask 1043456  }
 0x575   :  { %v400_v24 = vmul.f32 %v1429_v22, %v398_v14  ;;  %vm405_vm3 = vweird.f32 %v1429_v22  ;;  %v484_v48 = vmul.f32 %v482_v47, %v478_v20 }
 0x576   :  { %vm406_vm7 = vmor %vm404_vm4, %vm405_vm3 }
 0x577   :  { %v401_v25 = vsub.f32 1.0, %v400_v24 }
 0x579   :  { %v402_v26 = vmul.f32 %v1429_v22, %v401_v25 }
 0x57b   :  { %v403_v28 = vadd.f32 %v1429_v22, %v402_v26 }
 0x57d   :  { %v407_v32 = vsel %vm406_vm7, %v1429_v22, %v403_v28 }
 0x57e   :  { %v412_v46 = vsel %vm409_vm8, %v411_v41, %v407_v32 }
 0x57f   :  { %v415_v52 = vmul.f32 %v412_v46, %v1880_v27 }
 0x5ba   :  { %v487_v21 = vpop.permute.xlu2 %486 }
 0x5bb   :  { %v489_v23 = vmul.f32 %v487_v21, %v478_v20 }
 0x5bd   :  { %491 = vrot.lane.b32.xlu1 %v489_v23, %s1684_s2 }
 0x5d1   :  { %v418_v43 = vpop.permute.xlu1 %417 }
 0x5d2   :  { %v420_v31 = vmul.f32 %v418_v43, %v412_v46 }
 0x5d4   :  { %422 = vrot.lane.b32.xlu0 %v420_v31, %s1684_s2 }
 0x62f   :  { %v492_v49 = vpop.permute.xlu1 %491 }
 0x630   :  { %v1912_v50 = vadd.f32 %v492_v49, %v484_v48 }
 0x632   :  { %1430 = vtanh.f32 %v1912_v50 }
 0x638   :  { %v1431_v51 = vpop.eup %1430 }
 0x639   :  { %497 = vrot.lane.b32.xlu0 %v1431_v51, %s1683_s29 }
 0x646   :  { %v423_v53 = vpop.permute.xlu0 %422 }
 0x647   :  { %v1917_v54 = vadd.f32 %v423_v53, %v415_v52 }
 0x649   :  { %1432 = vtanh.f32 %v1917_v54 }
 0x64f   :  { %v1433_v56 = vpop.eup %1432 }
 0x650   :  { %428 = vrot.lane.b32.xlu2 %v1433_v56, %s1683_s29 }
 0x6aa   :  { %v429_v40 = vpop.permute.xlu2 %428 }
 0x6ab   :  { %v1921_v57 = vmul.f32 %v429_v40, %v412_v46  ;;  %v498_v58 = vpop.permute.xlu0 %497 }
 0x6ac   :  { %v500_v59 = vmul.f32 %v498_v58, %v478_v20 }
 0x6ad   :  { %v506_v60 = vrot.slane %v1921_v57, 4 }
 0x6ae   :  { %v572_v61 = vrot.slane %v500_v59, 4  ;;  %502 = vrot.lane.b32.xlu1 %v500_v59, %s1684_s2 }
 0x6af   :  { %507 = vrot.lane.b32.xlu2 %v506_v60, %s1683_s29 }
 0x6b0   :  { %573 = vrot.lane.b32.xlu0 %v572_v61, %s1684_s2 }
 0x709   :  { %v508_v27 = vpop.permute.xlu2 %507 }
 0x720   :  { %v503_v62 = vpop.permute.xlu1 %502 }
 0x721   :  { %v510_v63 = vsel %vm164_vm5, %v503_v62, %v508_v27  ;;  %v622_v62 = vrot.slane %v1912_v50, 6 }
 0x722   :  { %v512_v1 = vrot.slane %v510_v63, 4  ;;  %v574_v3 = vpop.permute.xlu0 %573 }
 0x723   :  { %1358 = vmatmul.msk.f32.vlgmr.msra.gmra.mxu1 %vm164_vm5, %v574_v3 }
 0x724   :  { %1356 = vmatmul.msk.f32.vlgmr.msrb.gmra.mxu3 %vm234_vm6, %v512_v1  ;;  %798 = vmatpush.msra.mxu1 %v1801_v33 }
 0x725   :  { %1075 = vmatpush.msrb.mxu3 %v1801_v33 }
 0x726   :  { %799 = vmatpush.msra.mxu1 %v1803_v34 }
 0x727   :  { %1076 = vmatpush.msrb.mxu3 %v1803_v34 }
 0x728   :  { %800 = vmatpush.msra.mxu1 %v1807_v35 }
 0x729   :  { %1077 = vmatpush.msrb.mxu3 %v1807_v35 }
 0x72a   :  { %801 = vmatpush.msra.mxu1 %v1812_v36 }
 0x72b   :  { %1078 = vmatpush.msrb.mxu3 %v1812_v36 }
 0x72c   :  { %802 = vmatpush.msra.mxu1 %v1817_v37 }
 0x72d   :  { %1079 = vmatpush.msrb.mxu3 %v1817_v37 }
 0x72e   :  { %803 = vmatpush.msra.mxu1 %v1822_v38 }
 0x72f   :  { %1080 = vmatpush.msrb.mxu3 %v1822_v38 }
 0x730   :  { %804 = vmatpush.msra.mxu1 %v1827_v39 }
 0x731   :  { %1081 = vmatpush.msrb.mxu3 %v1827_v39 }
 0x732   :  { %805 = vmatpush.msra.mxu1 %v1837_v42 }
 0x733   :  { %1082 = vmatpush.msrb.mxu3 %v1837_v42 }
 0x7a0   :  { %v594_v4 = vpop.f32.mrf.mxu1 }
 0x7a1   :  { %v598_v7 = vrot.slane %v594_v4, 2 }
 0x7a3   :  { %v600_v9 = vadd.f32 %v598_v7, %v1792_v10 }
 0x7a5   :  { %1434 = vtanh.f32 %v600_v9  ;;  %v1359_v18 = vmul.f32 -1.442695, %v600_v9 }
 0x7a7   :  { %v532_v11 = vpop.f32.mrf.mxu3 }
 0x7a8   :  { %v533_v12 = vadd.f32 %v1872_v45, %v532_v11  ;;  %v1264_v11 = vrot.slane %v1921_v57, 6 }
 0x7aa   :  { %1436 = vtanh.f32 %v533_v12  ;;  %v1357_v15 = vmul.f32 -1.442695, %v533_v12 }
 0x7ab   :  { %v1435_v13 = vpop.eup %1434 }
 0x7ac   :  { %626 = vrot.lane.b32.xlu1 %v1435_v13, %s1683_s29  ;;  %1438 = vpow2.f32 %v1357_v15  ;;  %v1278_v15 = vsel %vm1277_vm1, %v1889_v44, %v1264_v11 }
 0x7b0   :  { %v1437_v14 = vpop.eup %1436 }
 0x7b1   :  { %557 = vrot.lane.b32.xlu2 %v1437_v14, %s1683_s29 }
 0x7b2   :  { %v1439_v16 = vpop.eup %1438 }
 0x7b3   :  { %v538_v17 = vadd.f32 1.0, %v1439_v16 }
 0x7b5   :  { %1440 = vrcp.f32 %v538_v17  ;;  %v550_v25 = vand.u32 2147483648, %v538_v17  ;;  %vm544_vm10 = vweird.f32 %v538_v17  ;;  %v548_v26 = vand.u32 2147483647, %v538_v17 }
 0x7b6   :  { %1442 = vpow2.f32 %v1359_v18 }
 0x7b7   :  { %v551_v30 = vor.u32 1.1754944e-38, %v550_v25  ;;  %vm549_vm12 = vcmp.eq.f32.partialorder %v548_v26, 8.507059e+37 }
 0x7bb   :  { %v1441_v19 = vpop.eup %1440 }
 0x7bc   :  { %v540_v10 = vmul.f32 %v1441_v19, %v538_v17  ;;  %v1443_v20 = vpop.eup %1442  ;;  %vm545_vm9 = vweird.f32 %v1441_v19 }
 0x7bd   :  { %v604_v22 = vadd.f32 1.0, %v1443_v20  ;;  %vm546_vm11 = vmor %vm544_vm10, %vm545_vm9 }
 0x7be   :  { %v541_v21 = vsub.f32 1.0, %v540_v10 }
 0x7bf   :  { %1444 = vrcp.f32 %v604_v22  ;;  %v616_v49 = vand.u32 2147483648, %v604_v22  ;;  %vm610_vm14 = vweird.f32 %v604_v22  ;;  %v614_v51 = vand.u32 2147483647, %v604_v22 }
 0x7c0   :  { %v542_v23 = vmul.f32 %v1441_v19, %v541_v21 }
 0x7c1   :  { %v617_v53 = vor.u32 1.1754944e-38, %v616_v49  ;;  %vm615_vm0 = vcmp.eq.f32.partialorder %v614_v51, 8.507059e+37 }
 0x7c2   :  { %v543_v24 = vadd.f32 %v1441_v19, %v542_v23 }
 0x7c4   :  { %v547_v29 = vsel %vm546_vm11, %v1441_v19, %v543_v24 }
 0x7c5   :  { %v1445_v28 = vpop.eup %1444  ;;  %v552_v41 = vsel %vm549_vm12, %v551_v30, %v547_v29 }
 0x7c6   :  { %v606_v43 = vmul.f32 %v1445_v28, %v604_v22  ;;  %vm611_vm13 = vweird.f32 %v1445_v28  ;;  %v555_v59 = vmul.f32 %v552_v41, %v1917_v54 }
 0x7c7   :  { %vm612_vm15 = vmor %vm610_vm14, %vm611_vm13  ;;  %vm1281_vm13 = vcmask 1045504  }
 0x7c8   :  { %v607_v31 = vsub.f32 1.0, %v606_v43 }
 0x7ca   :  { %v608_v47 = vmul.f32 %v1445_v28, %v607_v31 }
 0x7cc   :  { %v609_v48 = vadd.f32 %v1445_v28, %v608_v47 }
 0x7ce   :  { %v613_v52 = vsel %vm612_vm15, %v1445_v28, %v609_v48 }
 0x7cf   :  { %v618_v40 = vsel %vm615_vm0, %v617_v53, %v613_v52 }
 0x7d0   :  { %v624_v63 = vmul.f32 %v622_v62, %v618_v40 }
 0x80b   :  { %v558_v32 = vpop.permute.xlu2 %557 }
 0x80c   :  { %v560_v46 = vmul.f32 %v558_v32, %v552_v41 }
 0x80e   :  { %562 = vrot.lane.b32.xlu1 %v560_v46, %s1684_s2 }
 0x81e   :  { %v627_v56 = vpop.permute.xlu1 %626 }
 0x81f   :  { %v629_v58 = vmul.f32 %v627_v56, %v618_v40 }
 0x821   :  { %631 = vrot.lane.b32.xlu0 %v629_v58, %s1684_s2 }
 0x880   :  { %v563_v60 = vpop.permute.xlu1 %562 }
 0x881   :  { %v1953_v61 = vadd.f32 %v563_v60, %v555_v59 }
 0x883   :  { %1446 = vtanh.f32 %v1953_v61 }
 0x889   :  { %v1447_v27 = vpop.eup %1446 }
 0x88a   :  { %568 = vrot.lane.b32.xlu0 %v1447_v27, %s1683_s29 }
 0x893   :  { %v632_v1 = vpop.permute.xlu0 %631 }
 0x894   :  { %v1958_v3 = vadd.f32 %v632_v1, %v624_v63 }
 0x896   :  { %1448 = vtanh.f32 %v1958_v3  ;;  %v759_v60 = vrot.slane %v1958_v3, 6 }
 0x89c   :  { %v1449_v4 = vpop.eup %1448 }
 0x89d   :  { %637 = vrot.lane.b32.xlu2 %v1449_v4, %s1683_s29 }
 0x8f7   :  { %v638_v54 = vpop.permute.xlu2 %637 }
 0x8f8   :  { %v640_v7 = vmul.f32 %v638_v54, %v618_v40 }
 0x8fa   :  { %v712_v9 = vrot.slane %v640_v7, 6  ;;  %642 = vrot.lane.b32.xlu2 %v640_v7, %s1684_s2 }
 0x8fc   :  { %713 = vrot.lane.b32.xlu1 %v712_v9, %s1684_s2  ;;  %v569_v12 = vpop.permute.xlu0 %568 }
 0x8fd   :  { %v571_v50 = vmul.f32 %v569_v12, %v552_v41 }
 0x8ff   :  { %v646_v13 = vrot.slane %v571_v50, 2  ;;  %v1266_v14 = vrot.slane %v571_v50, 4 }
 0x901   :  { %647 = vrot.lane.b32.xlu0 %v646_v13, %s1683_s29  ;;  %v1969_v16 = vsel %vm1279_vm2, %v1278_v15, %v1266_v14 }
 0x954   :  { %v643_v57 = vpop.permute.xlu2 %642 }
 0x96e   :  { %v714_v17 = vpop.permute.xlu1 %713 }
 0x96f   :  { %1362 = vmatmul.msk.f32.vlgmr.msrb.gmra.mxu1 %vm164_vm5, %v714_v17 }
 0x970   :  { %1141 = vmatpush.msrb.mxu1 %v1761_v0  ;;  %v1988_v0 = vadd.f32 %v1789_v8, %v1903_v55 }
 0x972   :  { %1142 = vmatpush.msrb.mxu1 %v1763_v2 }
 0x973   :  { %v648_v18 = vpop.permute.xlu0 %647 }
 0x974   :  { %v650_v19 = vsel %vm164_vm5, %v643_v57, %v648_v18  ;;  %1143 = vmatpush.msrb.mxu1 %v1766_v5 }
 0x975   :  { %v652_v10 = vrot.slane %v650_v19, 6 }
 0x976   :  { %1144 = vmatpush.msrb.mxu1 %v1771_v6 }
 0x977   :  { %1360 = vmatmul.msk.f32.vlgmr.msrb.gmra.mxu2 %vm234_vm6, %v652_v10 }
 0x978   :  { %1215 = vmatpush.msrb.mxu2 %v1801_v33 }
 0x97a   :  { %1216 = vmatpush.msrb.mxu2 %v1803_v34 }
 0x97c   :  { %1217 = vmatpush.msrb.mxu2 %v1807_v35 }
 0x97e   :  { %1218 = vmatpush.msrb.mxu2 %v1812_v36 }
 0x980   :  { %1219 = vmatpush.msrb.mxu2 %v1817_v37 }
 0x982   :  { %1220 = vmatpush.msrb.mxu2 %v1822_v38 }
 0x984   :  { %1221 = vmatpush.msrb.mxu2 %v1827_v39 }
 0x986   :  { %1222 = vmatpush.msrb.mxu2 %v1837_v42 }
 0x9ec   :  { %v734_v2 = vpop.f32.mrf.mxu1 }
 0x9ed   :  { %v737_v5 = vadd.f32 %v734_v2, %v1988_v0 }
 0x9ef   :  { %1450 = vtanh.f32 %v737_v5  ;;  %v1363_v38 = vmul.f32 -1.442695, %v737_v5 }
 0x9f5   :  { %v1451_v6 = vpop.eup %1450 }
 0x9f6   :  { %763 = vrot.lane.b32.xlu1 %v1451_v6, %s1683_s29 }
 0x9fa   :  { %v672_v33 = vpop.f32.mrf.mxu2 }
 0x9fb   :  { %v673_v34 = vadd.f32 %v1872_v45, %v672_v33 }
 0x9fd   :  { %1452 = vtanh.f32 %v673_v34  ;;  %v1361_v36 = vmul.f32 -1.442695, %v673_v34 }
 0x9ff   :  { %1454 = vpow2.f32 %v1361_v36 }
 0xa00   :  { %1456 = vpow2.f32 %v1363_v38 }
 0xa03   :  { %v1453_v35 = vpop.eup %1452 }
 0xa04   :  { %697 = vrot.lane.b32.xlu2 %v1453_v35, %s1683_s29 }
 0xa05   :  { %v1455_v37 = vpop.eup %1454 }
 0xa06   :  { %v678_v8 = vadd.f32 1.0, %v1455_v37  ;;  %v1457_v39 = vpop.eup %1456 }
 0xa07   :  { %v741_v44 = vadd.f32 1.0, %v1457_v39 }
 0xa08   :  { %1458 = vrcp.f32 %v678_v8  ;;  %v690_v25 = vand.u32 2147483648, %v678_v8  ;;  %vm684_vm4 = vweird.f32 %v678_v8  ;;  %v688_v26 = vand.u32 2147483647, %v678_v8 }
 0xa09   :  { %1460 = vrcp.f32 %v741_v44  ;;  %v753_v47 = vand.u32 2147483648, %v741_v44  ;;  %vm747_vm10 = vweird.f32 %v741_v44  ;;  %v751_v48 = vand.u32 2147483647, %v741_v44 }
 0xa0a   :  { %v691_v30 = vor.u32 1.1754944e-38, %v690_v25  ;;  %vm689_vm8 = vcmp.eq.f32.partialorder %v688_v26, 8.507059e+37 }
 0xa0b   :  { %v754_v51 = vor.u32 1.1754944e-38, %v753_v47  ;;  %vm752_vm12 = vcmp.eq.f32.partialorder %v751_v48, 8.507059e+37 }
 0xa0e   :  { %v1459_v42 = vpop.eup %1458 }
 0xa0f   :  { %v680_v55 = vmul.f32 %v1459_v42, %v678_v8  ;;  %v1461_v21 = vpop.eup %1460  ;;  %vm685_vm3 = vweird.f32 %v1459_v42 }
 0xa10   :  { %v743_v23 = vmul.f32 %v1461_v21, %v741_v44  ;;  %vm686_vm7 = vmor %vm684_vm4, %vm685_vm3  ;;  %vm748_vm9 = vweird.f32 %v1461_v21 }
 0xa11   :  { %v681_v20 = vsub.f32 1.0, %v680_v55  ;;  %vm749_vm11 = vmor %vm747_vm10, %vm748_vm9 }
 0xa12   :  { %v744_v28 = vsub.f32 1.0, %v743_v23 }
 0xa13   :  { %v682_v22 = vmul.f32 %v1459_v42, %v681_v20 }
 0xa14   :  { %v745_v32 = vmul.f32 %v1461_v21, %v744_v28 }
 0xa15   :  { %v683_v24 = vadd.f32 %v1459_v42, %v682_v22 }
 0xa16   :  { %v746_v31 = vadd.f32 %v1461_v21, %v745_v32 }
 0xa17   :  { %v687_v29 = vsel %vm686_vm7, %v1459_v42, %v683_v24 }
 0xa18   :  { %v692_v43 = vsel %vm689_vm8, %v691_v30, %v687_v29  ;;  %v750_v49 = vsel %vm749_vm11, %v1461_v21, %v746_v31 }
 0xa19   :  { %v755_v53 = vsel %vm752_vm12, %v754_v51, %v750_v49  ;;  %v695_v40 = vmul.f32 %v692_v43, %v1953_v61 }
 0xa1a   :  { %v761_v62 = vmul.f32 %v759_v60, %v755_v53 }
 0xa5e   :  { %v698_v41 = vpop.permute.xlu2 %697 }
 0xa5f   :  { %v700_v46 = vmul.f32 %v698_v41, %v692_v43 }
 0xa61   :  { %702 = vrot.lane.b32.xlu1 %v700_v46, %s1684_s2 }
 0xa68   :  { %v764_v52 = vpop.permute.xlu1 %763 }
 0xa69   :  { %v766_v56 = vmul.f32 %v764_v52, %v755_v53 }
 0xa6b   :  { %768 = vrot.lane.b32.xlu0 %v766_v56, %s1684_s2 }
 0xad3   :  { %v703_v58 = vpop.permute.xlu1 %702 }
 0xad4   :  { %v1997_v59 = vadd.f32 %v703_v58, %v695_v40 }
 0xad6   :  { %1462 = vtanh.f32 %v1997_v59 }
 0xadc   :  { %v1463_v27 = vpop.eup %1462 }
 0xadd   :  { %708 = vrot.lane.b32.xlu0 %v1463_v27, %s1683_s29  ;;  %v769_v63 = vpop.permute.xlu0 %768 }
 0xade   :  { %v2002_v1 = vadd.f32 %v769_v63, %v761_v62 }
 0xae0   :  { %1464 = vtanh.f32 %v2002_v1  ;;  %v894_v47 = vrot.slane %v2002_v1, 6 }
 0xae6   :  { %v1465_v4 = vpop.eup %1464 }
 0xae7   :  { %774 = vrot.lane.b32.xlu2 %v1465_v4, %s1683_s29 }
 0xb41   :  { %v775_v61 = vpop.permute.xlu2 %774 }
 0xb42   :  { %v777_v54 = vmul.f32 %v775_v61, %v755_v53 }
 0xb44   :  { %779 = vrot.lane.b32.xlu1 %v777_v54, %s1684_s2 }
 0xb4f   :  { %v709_v7 = vpop.permute.xlu0 %708 }
 0xb50   :  { %v711_v9 = vmul.f32 %v709_v7, %v692_v43 }
 0xb52   :  { %v1268_v3 = vrot.slane %v711_v9, 2  ;;  %783 = vrot.lane.b32.xlu2 %v711_v9, %s1683_s29 }
 0xb54   :  { %v2010_v11 = vsel %vm1281_vm13, %v1969_v16, %v1268_v3 }
 0xbac   :  { %v784_v12 = vpop.permute.xlu2 %783 }
 0xbb6   :  { %v780_v50 = vpop.permute.xlu1 %779 }
 0xbb7   :  { %v786_v13 = vsel %vm164_vm5, %v780_v50, %v784_v12  ;;  %1366 = vmatmul.msk.f32.vlgmr.msra.gmra.mxu3 %vm164_vm5, %v780_v50 }
 0xbb8   :  { %1364 = vmatmul.msk.f32.vlgmr.msra.gmra.mxu1 %vm234_vm6, %v786_v13 }
 0xc35   :  { %v807_v14 = vpop.f32.mrf.mxu1 }
 0xc36   :  { %v808_v15 = vadd.f32 %v1872_v45, %v807_v14 }
 0xc38   :  { %1466 = vtanh.f32 %v808_v15  ;;  %v1365_v10 = vmul.f32 -1.442695, %v808_v15 }
 0xc3a   :  { %v866_v17 = vpop.f32.mrf.mxu3 }
 0xc3b   :  { %v870_v57 = vrot.slane %v866_v17, 6 }
 0xc3d   :  { %v872_v18 = vadd.f32 %v870_v57, %v1988_v0 }
 0xc3e   :  { %v1467_v19 = vpop.eup %1466 }
 0xc3f   :  { %1468 = vtanh.f32 %v872_v18  ;;  %832 = vrot.lane.b32.xlu1 %v1467_v19, %s1683_s29  ;;  %v1367_v2 = vmul.f32 -1.442695, %v872_v18 }
 0xc40   :  { %1470 = vpow2.f32 %v1365_v10 }
 0xc41   :  { %1472 = vpow2.f32 %v1367_v2 }
 0xc45   :  { %v1469_v16 = vpop.eup %1468 }
 0xc46   :  { %898 = vrot.lane.b32.xlu0 %v1469_v16, %s1683_s29  ;;  %v1471_v5 = vpop.eup %1470 }
 0xc47   :  { %v813_v6 = vadd.f32 1.0, %v1471_v5  ;;  %v1473_v33 = vpop.eup %1472 }
 0xc48   :  { %v876_v34 = vadd.f32 1.0, %v1473_v33 }
 0xc49   :  { %1474 = vrcp.f32 %v813_v6  ;;  %v825_v55 = vand.u32 2147483648, %v813_v6  ;;  %vm819_vm15 = vweird.f32 %v813_v6  ;;  %v823_v20 = vand.u32 2147483647, %v813_v6 }
 0xc4a   :  { %1476 = vrcp.f32 %v876_v34  ;;  %v888_v29 = vand.u32 2147483648, %v876_v34  ;;  %vm882_vm7 = vweird.f32 %v876_v34  ;;  %v886_v30 = vand.u32 2147483647, %v876_v34 }
 0xc4b   :  { %v826_v23 = vor.u32 1.1754944e-38, %v825_v55  ;;  %vm824_vm3 = vcmp.eq.f32.partialorder %v823_v20, 8.507059e+37 }
 0xc4c   :  { %v889_v41 = vor.u32 1.1754944e-38, %v888_v29  ;;  %vm887_vm9 = vcmp.eq.f32.partialorder %v886_v30, 8.507059e+37 }
 0xc4f   :  { %v1475_v35 = vpop.eup %1474 }
 0xc50   :  { %v815_v36 = vmul.f32 %v1475_v35, %v813_v6  ;;  %v1477_v37 = vpop.eup %1476  ;;  %vm820_vm14 = vweird.f32 %v1475_v35 }
 0xc51   :  { %v878_v8 = vmul.f32 %v1477_v37, %v876_v34  ;;  %vm821_vm0 = vmor %vm819_vm15, %vm820_vm14  ;;  %vm883_vm4 = vweird.f32 %v1477_v37 }
 0xc52   :  { %v816_v38 = vsub.f32 1.0, %v815_v36  ;;  %vm884_vm8 = vmor %vm882_vm7, %vm883_vm4 }
 0xc53   :  { %v879_v42 = vsub.f32 1.0, %v878_v8 }
 0xc54   :  { %v817_v39 = vmul.f32 %v1475_v35, %v816_v38 }
 0xc55   :  { %v880_v21 = vmul.f32 %v1477_v37, %v879_v42 }
 0xc56   :  { %v818_v44 = vadd.f32 %v1475_v35, %v817_v39 }
 0xc57   :  { %v881_v26 = vadd.f32 %v1477_v37, %v880_v21 }
 0xc58   :  { %v822_v22 = vsel %vm821_vm0, %v1475_v35, %v818_v44 }
 0xc59   :  { %v827_v25 = vsel %vm824_vm3, %v826_v23, %v822_v22  ;;  %v885_v32 = vsel %vm884_vm8, %v1477_v37, %v881_v26 }
 0xc5a   :  { %v890_v43 = vsel %vm887_vm9, %v889_v41, %v885_v32  ;;  %v830_v53 = vmul.f32 %v827_v25, %v1997_v59 }
 0xc5b   :  { %v896_v48 = vmul.f32 %v894_v47, %v890_v43 }
 0xcb1   :  { %v833_v24 = vpop.permute.xlu1 %832 }
 0xcb2   :  { %v835_v28 = vmul.f32 %v833_v24, %v827_v25 }
 0xcb4   :  { %837 = vrot.lane.b32.xlu0 %v835_v28, %s1684_s2 }
 0xcb8   :  { %v899_v46 = vpop.permute.xlu0 %898 }
 0xcb9   :  { %v901_v31 = vmul.f32 %v899_v46, %v890_v43 }
 0xcbb   :  { %903 = vrot.lane.b32.xlu2 %v901_v31, %s1684_s2 }
 0xd15   :  { %v904_v49 = vpop.permute.xlu2 %903 }
 0xd16   :  { %v2022_v51 = vadd.f32 %v904_v49, %v896_v48 }
 0xd18   :  { %1478 = vtanh.f32 %v2022_v51  ;;  %v1034_v31 = vrot.slane %v2022_v51, 6 }
 0xd1e   :  { %v1479_v52 = vpop.eup %1478 }
 0xd1f   :  { %909 = vrot.lane.b32.xlu1 %v1479_v52, %s1683_s29 }
 0xd26   :  { %v838_v56 = vpop.permute.xlu0 %837 }
 0xd27   :  { %v2027_v40 = vadd.f32 %v838_v56, %v830_v53 }
 0xd29   :  { %1480 = vtanh.f32 %v2027_v40 }
 0xd2f   :  { %v1481_v58 = vpop.eup %1480 }
 0xd30   :  { %843 = vrot.lane.b32.xlu2 %v1481_v58, %s1683_s29 }
 0xd8a   :  { %v844_v60 = vpop.permute.xlu2 %843 }
 0xd8b   :  { %v2031_v27 = vmul.f32 %v844_v60, %v827_v25 }
 0xd8d   :  { %v918_v62 = vrot.slane %v2031_v27, 6 }
 0xd8f   :  { %919 = vrot.lane.b32.xlu2 %v918_v62, %s1683_s29 }
 0xd91   :  { %v910_v63 = vpop.permute.xlu1 %909 }
 0xd92   :  { %v912_v1 = vmul.f32 %v910_v63, %v890_v43 }
 0xd94   :  { %v984_v4 = vrot.slane %v912_v1, 2  ;;  %914 = vrot.lane.b32.xlu1 %v912_v1, %s1684_s2 }
 0xd96   :  { %985 = vrot.lane.b32.xlu0 %v984_v4, %s1684_s2 }
 0xde9   :  { %v920_v59 = vpop.permute.xlu2 %919 }
 0xe06   :  { %v915_v61 = vpop.permute.xlu1 %914 }
 0xe07   :  { %v922_v54 = vsel %vm164_vm5, %v915_v61, %v920_v59 }
 0xe08   :  { %v924_v7 = vrot.slane %v922_v54, 2  ;;  %v986_v9 = vpop.permute.xlu0 %985 }
 0xe09   :  { %1370 = vmatmul.msk.f32.vlgmr.msra.gmra.mxu2 %vm164_vm5, %v986_v9 }
 0xe0a   :  { %1368 = vmatmul.msk.f32.vlgmr.msra.gmra.mxu0 %vm234_vm6, %v924_v7 }
 0xe87   :  { %v944_v3 = vpop.f32.mrf.mxu0 }
 0xe88   :  { %v945_v12 = vadd.f32 %v1872_v45, %v944_v3 }
 0xe8a   :  { %1482 = vtanh.f32 %v945_v12  ;;  %v1369_v57 = vmul.f32 -1.442695, %v945_v12  ;;  %v2070_v12 = vld [vmem:[%s2112_s5] ss:$0 sm:$0xff] }
 0xe8c   :  { %v1006_v50 = vpop.f32.mrf.mxu2 }
 0xe8d   :  { %v1010_v13 = vrot.slane %v1006_v50, 4 }
 0xe8f   :  { %v1012_v14 = vadd.f32 %v1010_v13, %v1988_v0 }
 0xe90   :  { %v1483_v15 = vpop.eup %1482 }
 0xe91   :  { %1484 = vtanh.f32 %v1012_v14  ;;  %969 = vrot.lane.b32.xlu0 %v1483_v15, %s1683_s29  ;;  %v1371_v18 = vmul.f32 -1.442695, %v1012_v14 }
 0xe92   :  { %1486 = vpow2.f32 %v1369_v57 }
 0xe93   :  { %1488 = vpow2.f32 %v1371_v18 }
 0xe97   :  { %v1485_v17 = vpop.eup %1484 }
 0xe98   :  { %1038 = vrot.lane.b32.xlu1 %v1485_v17, %s1683_s29  ;;  %v1487_v19 = vpop.eup %1486 }
 0xe99   :  { %v950_v16 = vadd.f32 1.0, %v1487_v19  ;;  %v1489_v10 = vpop.eup %1488 }
 0xe9a   :  { %v1016_v45 = vadd.f32 1.0, %v1489_v10 }
 0xe9b   :  { %1490 = vrcp.f32 %v950_v16  ;;  %v962_v38 = vand.u32 2147483648, %v950_v16  ;;  %vm956_vm11 = vweird.f32 %v950_v16  ;;  %v960_v8 = vand.u32 2147483647, %v950_v16 }
 0xe9c   :  { %1492 = vrcp.f32 %v1016_v45  ;;  %v1028_v23 = vand.u32 2147483648, %v1016_v45  ;;  %vm1022_vm0 = vweird.f32 %v1016_v45  ;;  %v1026_v24 = vand.u32 2147483647, %v1016_v45 }
 0xe9d   :  { %v963_v44 = vor.u32 1.1754944e-38, %v962_v38  ;;  %vm961_vm14 = vcmp.eq.f32.partialorder %v960_v8, 8.507059e+37 }
 0xe9e   :  { %v1029_v26 = vor.u32 1.1754944e-38, %v1028_v23  ;;  %vm1027_vm4 = vcmp.eq.f32.partialorder %v1026_v24, 8.507059e+37 }
 0xea1   :  { %v1491_v2 = vpop.eup %1490 }
 0xea2   :  { %v952_v5 = vmul.f32 %v1491_v2, %v950_v16  ;;  %v1493_v6 = vpop.eup %1492  ;;  %vm957_vm10 = vweird.f32 %v1491_v2 }
 0xea3   :  { %v1018_v34 = vmul.f32 %v1493_v6, %v1016_v45  ;;  %vm958_vm12 = vmor %vm956_vm11, %vm957_vm10  ;;  %vm1023_vm15 = vweird.f32 %v1493_v6 }
 0xea4   :  { %v953_v33 = vsub.f32 1.0, %v952_v5  ;;  %vm1024_vm3 = vmor %vm1022_vm0, %vm1023_vm15 }
 0xea5   :  { %v1019_v36 = vsub.f32 1.0, %v1018_v34 }
 0xea6   :  { %v954_v35 = vmul.f32 %v1491_v2, %v953_v33 }
 0xea7   :  { %v1020_v39 = vmul.f32 %v1493_v6, %v1019_v36 }
 0xea8   :  { %v955_v37 = vadd.f32 %v1491_v2, %v954_v35 }
 0xea9   :  { %v1021_v21 = vadd.f32 %v1493_v6, %v1020_v39 }
 0xeaa   :  { %v959_v42 = vsel %vm958_vm12, %v1491_v2, %v955_v37 }
 0xeab   :  { %v964_v55 = vsel %vm961_vm14, %v963_v44, %v959_v42  ;;  %v1025_v25 = vsel %vm1024_vm3, %v1493_v6, %v1021_v21 }
 0xeac   :  { %v1030_v29 = vsel %vm1027_vm4, %v1029_v26, %v1025_v25  ;;  %v967_v32 = vmul.f32 %v964_v55, %v2027_v40 }
 0xead   :  { %v1036_v47 = vmul.f32 %v1034_v31, %v1030_v29 }
 0xf03   :  { %v970_v20 = vpop.permute.xlu0 %969 }
 0xf04   :  { %v972_v22 = vmul.f32 %v970_v20, %v964_v55 }
 0xf06   :  { %974 = vrot.lane.b32.xlu2 %v972_v22, %s1684_s2 }
 0xf0a   :  { %v1039_v28 = vpop.permute.xlu1 %1038 }
 0xf0b   :  { %v1041_v30 = vmul.f32 %v1039_v28, %v1030_v29 }
 0xf0d   :  { %1043 = vrot.lane.b32.xlu0 %v1041_v30, %s1684_s2 }
 0xf60   :  { %v975_v41 = vpop.permute.xlu2 %974 }
 0xf61   :  { %v2047_v43 = vadd.f32 %v975_v41, %v967_v32 }
 0xf63   :  { %1494 = vtanh.f32 %v2047_v43 }
 0xf69   :  { %v1495_v46 = vpop.eup %1494 }
 0xf6a   :  { %980 = vrot.lane.b32.xlu1 %v1495_v46, %s1683_s29 }
 0xf7f   :  { %v1044_v48 = vpop.permute.xlu0 %1043 }
 0xf80   :  { %v2052_v49 = vadd.f32 %v1044_v48, %v1036_v47 }
 0xf82   :  { %1496 = vtanh.f32 %v2052_v49  ;;  %v1174_v26 = vrot.slane %v2052_v49, 6 }
 0xf88   :  { %v1497_v52 = vpop.eup %1496 }
 0xf89   :  { %1049 = vrot.lane.b32.xlu2 %v1497_v52, %s1683_s29 }
 0xfdc   :  { %v981_v53 = vpop.permute.xlu1 %980 }
 0xfdd   :  { %v2056_v56 = vmul.f32 %v981_v53, %v964_v55 }
 0xfdf   :  { %v1058_v40 = vrot.slane %v2056_v56, 4  ;;  %v1270_v49 = vrot.slane %v2056_v56, 6 }
 0xfe1   :  { %1059 = vrot.lane.b32.xlu1 %v1058_v40, %s1683_s29 }
 0xfe3   :  { %v1050_v58 = vpop.permute.xlu2 %1049 }
 0xfe4   :  { %v1052_v60 = vmul.f32 %v1050_v58, %v1030_v29 }
 0xfe6   :  { %v1124_v62 = vrot.slane %v1052_v60, 4  ;;  %1054 = vrot.lane.b32.xlu0 %v1052_v60, %s1684_s2 }
 0xfe8   :  { %1125 = vrot.lane.b32.xlu2 %v1124_v62, %s1684_s2 }
0x1042   :  { %v1126_v51 = vpop.permute.xlu2 %1125 }
0x1043   :  { %1374 = vmatmul.msk.f32.vlgmr.msrb.gmra.mxu1 %vm164_vm5, %v1126_v51 }
0x1053   :  { %v1060_v63 = vpop.permute.xlu1 %1059 }
0x1058   :  { %v1055_v1 = vpop.permute.xlu0 %1054 }
0x1059   :  { %v1062_v4 = vsel %vm164_vm5, %v1055_v1, %v1060_v63 }
0x105a   :  { %v1064_v59 = vrot.slane %v1062_v4, 4 }
0x105c   :  { %1372 = vmatmul.msk.f32.vlgmr.msrb.gmra.mxu3 %vm234_vm6, %v1064_v59 }
0x10c0   :  { %v1146_v61 = vpop.f32.mrf.mxu1 }
0x10c1   :  { %v1150_v54 = vrot.slane %v1146_v61, 2 }
0x10c3   :  { %v1152_v7 = vadd.f32 %v1150_v54, %v1988_v0 }
0x10c5   :  { %1498 = vtanh.f32 %v1152_v7  ;;  %v1375_v14 = vmul.f32 -1.442695, %v1152_v7 }
0x10cb   :  { %v1499_v9 = vpop.eup %1498 }
0x10cc   :  { %1178 = vrot.lane.b32.xlu1 %v1499_v9, %s1683_s29  ;;  %v162_v9 = vld [vmem:[#allocation10 + $0x18] sm:$0xff] }
0x10cd   :  { %1311 = vmatpush.msrb.mxu0 %v162_v9 }
0x10df   :  { %v1084_v3 = vpop.f32.mrf.mxu3 }
0x10e0   :  { %v1085_v50 = vadd.f32 %v2070_v12, %v1084_v3  ;;  %v161_v3 = vld [vmem:[#allocation10 + $0x10] sm:$0xff] }
0x10e1   :  { %1312 = vmatpush.msrb.mxu0 %v161_v3 }
0x10e2   :  { %1500 = vtanh.f32 %v1085_v50  ;;  %v1373_v18 = vmul.f32 -1.442695, %v1085_v50  ;;  %v160_v50 = vld [vmem:[#allocation10 + $0x8] sm:$0xff] }
0x10e3   :  { %1502 = vpow2.f32 %v1375_v14  ;;  %1313 = vmatpush.msrb.mxu0 %v160_v50 }
0x10e8   :  { %v1501_v13 = vpop.eup %1500 }
0x10e9   :  { %1109 = vrot.lane.b32.xlu0 %v1501_v13, %s1683_s29  ;;  %v1503_v15 = vpop.eup %1502  ;;  %v159_v13 = vld [vmem:[#allocation10] sm:$0xff] }
0x10ea   :  { %v1156_v0 = vadd.f32 1.0, %v1503_v15  ;;  %1314 = vmatpush.msrb.mxu0 %v159_v13 }
0x10ec   :  { %1504 = vrcp.f32 %v1156_v0  ;;  %v1168_v2 = vand.u32 2147483648, %v1156_v0  ;;  %vm1162_vm8 = vweird.f32 %v1156_v0  ;;  %v1166_v5 = vand.u32 2147483647, %v1156_v0 }
0x10ed   :  { %1506 = vpow2.f32 %v1373_v18 }
0x10ee   :  { %v1169_v34 = vor.u32 1.1754944e-38, %v1168_v2  ;;  %vm1167_vm10 = vcmp.eq.f32.partialorder %v1166_v5, 8.507059e+37 }
0x10f2   :  { %v1505_v17 = vpop.eup %1504 }
0x10f3   :  { %v1158_v57 = vmul.f32 %v1505_v17, %v1156_v0  ;;  %vm1163_vm7 = vweird.f32 %v1505_v17  ;;  %v1507_v45 = vpop.eup %1506 }
0x10f4   :  { %vm1164_vm9 = vmor %vm1162_vm8, %vm1163_vm7  ;;  %v1090_v6 = vadd.f32 1.0, %v1507_v45 }
0x10f5   :  { %v1159_v19 = vsub.f32 1.0, %v1158_v57 }
0x10f6   :  { %1508 = vrcp.f32 %v1090_v6  ;;  %v1102_v55 = vand.u32 2147483648, %v1090_v6  ;;  %vm1096_vm12 = vweird.f32 %v1090_v6  ;;  %v1100_v20 = vand.u32 2147483647, %v1090_v6 }
0x10f7   :  { %v1160_v16 = vmul.f32 %v1505_v17, %v1159_v19 }
0x10f8   :  { %v1103_v22 = vor.u32 1.1754944e-38, %v1102_v55  ;;  %vm1101_vm15 = vcmp.eq.f32.partialorder %v1100_v20, 8.507059e+37 }
0x10f9   :  { %v1161_v10 = vadd.f32 %v1505_v17, %v1160_v16 }
0x10fb   :  { %v1165_v33 = vsel %vm1164_vm9, %v1505_v17, %v1161_v10 }
0x10fc   :  { %v1170_v36 = vsel %vm1167_vm10, %v1169_v34, %v1165_v33  ;;  %v1509_v38 = vpop.eup %1508 }
0x10fd   :  { %v1092_v8 = vmul.f32 %v1509_v38, %v1090_v6  ;;  %vm1097_vm11 = vweird.f32 %v1509_v38  ;;  %v1176_v28 = vmul.f32 %v1174_v26, %v1170_v36 }
0x10fe   :  { %vm1098_vm14 = vmor %vm1096_vm12, %vm1097_vm11 }
0x10ff   :  { %v1093_v39 = vsub.f32 1.0, %v1092_v8 }
0x1101   :  { %v1094_v42 = vmul.f32 %v1509_v38, %v1093_v39 }
0x1103   :  { %v1095_v44 = vadd.f32 %v1509_v38, %v1094_v42 }
0x1105   :  { %v1099_v21 = vsel %vm1098_vm14, %v1509_v38, %v1095_v44 }
0x1106   :  { %v1104_v24 = vsel %vm1101_vm15, %v1103_v22, %v1099_v21 }
0x1107   :  { %v1107_v32 = vmul.f32 %v1104_v24, %v2047_v43  ;;  %v1283_v43 = vsel %vm1277_vm1, %v2031_v27, %v1270_v49 }
0x113e   :  { %v1179_v35 = vpop.permute.xlu1 %1178 }
0x113f   :  { %v1181_v37 = vmul.f32 %v1179_v35, %v1170_v36  ;;  %v1393_v35 = vld [vmem:[%s2114_s7] ss:$0 sm:$0xff] }
0x1141   :  { %1183 = vrot.lane.b32.xlu0 %v1181_v37, %s1684_s2 }
0x115b   :  { %v1110_v23 = vpop.permute.xlu0 %1109 }
0x115c   :  { %v1112_v25 = vmul.f32 %v1110_v23, %v1104_v24 }
0x115e   :  { %1114 = vrot.lane.b32.xlu2 %v1112_v25, %s1684_s2 }
0x11b3   :  { %v1184_v29 = vpop.permute.xlu0 %1183 }
0x11b4   :  { %v1186_v30 = vadd.f32 %v1184_v29, %v1176_v28 }
0x11b6   :  { %1510 = vtanh.f32 %v1186_v30 }
0x11b8   :  { %v1115_v41 = vpop.permute.xlu2 %1114 }
0x11b9   :  { %v1117_v46 = vadd.f32 %v1115_v41, %v1107_v32 }
0x11bb   :  { %1512 = vtanh.f32 %v1117_v46 }
0x11bc   :  { %v1511_v31 = vpop.eup %1510 }
0x11bd   :  { %1189 = vrot.lane.b32.xlu2 %v1511_v31, %s1683_s29 }
0x11c1   :  { %v1513_v47 = vpop.eup %1512 }
0x11c2   :  { %1120 = vrot.lane.b32.xlu1 %v1513_v47, %s1683_s29 }
0x1217   :  { %v1190_v48 = vpop.permute.xlu2 %1189 }
0x1218   :  { %v1192_v52 = vmul.f32 %v1190_v48, %v1170_v36 }
0x121a   :  { %1194 = vrot.lane.b32.xlu0 %v1192_v52, %s1684_s2 }
0x1234   :  { %v1121_v53 = vpop.permute.xlu1 %1120 }
0x1235   :  { %v1123_v40 = vmul.f32 %v1121_v53, %v1104_v24 }
0x1237   :  { %v1198_v58 = vrot.slane %v1123_v40, 2  ;;  %v1272_v60 = vrot.slane %v1123_v40, 4 }
0x1239   :  { %1199 = vrot.lane.b32.xlu1 %v1198_v58, %s1683_s29  ;;  %v1284_v62 = vsel %vm1279_vm2, %v1283_v43, %v1272_v60 }
0x128c   :  { %v1195_v51 = vpop.permute.xlu0 %1194 }
0x12ab   :  { %v1200_v63 = vpop.permute.xlu1 %1199 }
0x12ac   :  { %v1202_v1 = vsel %vm164_vm5, %v1195_v51, %v1200_v63 }
0x12ad   :  { %v1204_v4 = vrot.slane %v1202_v1, 6 }
0x12af   :  { %1376 = vmatmul.msk.f32.vlgmr.msrb.gmra.mxu2 %vm234_vm6, %v1204_v4 }
0x1332   :  { %v1224_v59 = vpop.f32.mrf.mxu2 }
0x1333   :  { %v1225_v56 = vadd.f32 %v2070_v12, %v1224_v59 }
0x1335   :  { %1514 = vtanh.f32 %v1225_v56  ;;  %v1377_v27 = vmul.f32 -1.442695, %v1225_v56 }
0x1337   :  { %1516 = vpow2.f32 %v1377_v27 }
0x133b   :  { %v1515_v61 = vpop.eup %1514 }
0x133c   :  { %1249 = vrot.lane.b32.xlu2 %v1515_v61, %s1683_s29 }
0x133d   :  { %v1517_v54 = vpop.eup %1516 }
0x133e   :  { %v1230_v7 = vadd.f32 1.0, %v1517_v54 }
0x1340   :  { %1518 = vrcp.f32 %v1230_v7  ;;  %vm1236_vm1 = vweird.f32 %v1230_v7  ;;  %v1240_v57 = vand.u32 2147483647, %v1230_v7 }
0x1342   :  { %vm1241_vm0 = vcmp.eq.f32.partialorder %v1240_v57, 8.507059e+37 }
0x1344   :  { %1291 = vrot.lane.b32.xlu2 %v2010_v11, %s1684_s2  ;;  %v1242_v11 = vand.u32 2147483648, %v1230_v7 }
0x1346   :  { %v1519_v12 = vpop.eup %1518  ;;  %v1243_v19 = vor.u32 1.1754944e-38, %v1242_v11 }
0x1347   :  { %v1232_v14 = vmul.f32 %v1519_v12, %v1230_v7  ;;  %vm1237_vm6 = vweird.f32 %v1519_v12 }
0x1348   :  { %vm1238_vm2 = vmor %vm1236_vm1, %vm1237_vm6 }
0x1349   :  { %v1233_v15 = vsub.f32 1.0, %v1232_v14 }
0x134b   :  { %v1234_v0 = vmul.f32 %v1519_v12, %v1233_v15 }
0x134d   :  { %v1235_v17 = vadd.f32 %v1519_v12, %v1234_v0 }
0x134f   :  { %v1239_v18 = vsel %vm1238_vm2, %v1519_v12, %v1235_v17 }
0x1350   :  { %v1244_v10 = vsel %vm1241_vm0, %v1243_v19, %v1239_v18 }
0x1351   :  { %v1247_v5 = vmul.f32 %v1244_v10, %v1117_v46 }
0x1396   :  { %v1250_v16 = vpop.permute.xlu2 %1249 }
0x1397   :  { %v1252_v45 = vmul.f32 %v1250_v16, %v1244_v10 }
0x1399   :  { %1254 = vrot.lane.b32.xlu0 %v1252_v45, %s1684_s2 }
0x139e   :  { %v1292_v2 = vpop.permute.xlu2 %1291 }
0x139f   :  { %1378 = vmatmul.msk.f32.vlgmr.msrb.gmra.mxu0 %vm164_vm5, %v1292_v2 }
0x140b   :  { %v1255_v6 = vpop.permute.xlu0 %1254 }
0x140c   :  { %v1257_v33 = vadd.f32 %v1255_v6, %v1247_v5 }
0x140e   :  { %1520 = vtanh.f32 %v1257_v33 }
0x1414   :  { %v1521_v34 = vpop.eup %1520 }
0x1415   :  { %1260 = vrot.lane.b32.xlu1 %v1521_v34, %s1683_s29 }
0x141c   :  { %v1316_v36 = vpop.f32.mrf.mxu0 }
0x141d   :  { %v1317_v37 = vadd.f32 %v1393_v35, %v1316_v36 }
0x141f   :  { %1322 = vst [vmem:[#allocation11] sm:$0xff] %v1317_v37 }
0x1487   :  { %v1261_v38 = vpop.permute.xlu1 %1260 }
0x1488   :  { %v1263_v8 = vmul.f32 %v1261_v38, %v1244_v10 }
0x148a   :  { %v1275_v39 = vrot.slane %v1263_v8, 2 }
0x148c   :  { %v1285_v42 = vsel %vm1281_vm13, %v1284_v62, %v1275_v39 }
0x148d   :  { %1293 = vrot.lane.b32.xlu0 %v1285_v42, %s1684_s2 }
0x14ff   :  { %v1294_v44 = vpop.permute.xlu0 %1293 }
0x1500   :  { %1379 = vmatmul.msk.f32.gmra.mxu0 %vm164_vm5, %v1294_v44 }
0x157d   :  { %v1319_v55 = vpop.f32.mrf.mxu0 }
0x157e   :  { %v1320_v20 = vadd.f32 %v1393_v35, %v1319_v55 }
0x1580   :  { %1323 = vst [vmem:[#allocation11 + $0x8] sm:$0xff] %v1320_v20 }
0x1581   :  { %1336 = dma.vmem_to_hbm [thread:$0]  %s1329_s16, 256, %s1331_s1, [#allocation4], %s1676_s13, %s1676_s13, %s1677_s14  }
0x1582   :  { %1673 = dma.done.wait [#allocation4], 256  }
0x1583   :  { %1674 = vsyncadd [#allocation4], 4294967040 }
0x1584   :  { %1341 = vsyncpa [#allocation3], 1 }
0x1585   :  { %1342 = vsyncpa [#allocation6], 1 }
0x1586   :  { %1343 = vsyncpa [#allocation9], 1 }
0x1587   :  { %1344 = vsyncpa [#allocation4], 1 }

</bundles_post_ra>
